<compile_context>
chip_gen: v5e
topology: v5e:2x2
jax: 0.10.0
libtpu: 0.0.40
codegen_flags: <defaults>
</compile_context>

<pallas_src>
import math
import jax
import jax.numpy as jnp
from jax.experimental import pallas as pl
from jax.experimental.pallas import tpu as pltpu

# ArcMarginProduct constants (CFG.s = 30, CFG.margin = 0.5)
S_SCALE = 30.0
MARGIN = 0.5
COS_M = math.cos(MARGIN)
SIN_M = math.sin(MARGIN)
TH = math.cos(math.pi - MARGIN)
MM = math.sin(math.pi - MARGIN) * MARGIN
BN_EPS = 1e-5          # nn.BatchNorm1d default eps (scale cancels; kept for reference)
NORM_EPS = 1e-12       # F.normalize default eps


def _make_head_kernel(tile_n: int, inv_hw: float):
    def kernel(x_ref, wfc_ref, bfc_ref, warc_ref, invwn_ref, labels_ref,
               out_ref, feat_ref):
        # x_ref:      (B, H*W, C)    backbone feature map, C on lanes
        # wfc_ref:    (C, FC)        fc weight (in x out), bf16
        # bfc_ref:    (1, FC)        fc bias, f32
        # warc_ref:   (FC, TILE_N)   ArcMargin weight tile (pre-transposed), bf16
        # invwn_ref:  (1, TILE_N)    1 / ||w_class|| for this tile, f32
        # labels_ref: (B, 1)         int32 labels
        # out_ref:    (B, TILE_N)    arc-margin logits tile
        # feat_ref:   (B, FC)        VMEM scratch: normalized fc feature (bf16)
        j = pl.program_id(0)

        # ---- compute the shared feature vector once, keep it in scratch ----
        @pl.when(j == 0)
        def _():
            x = x_ref[...].astype(jnp.float32)                    # (B, HW, C)
            pooled = jnp.sum(x, axis=1) * inv_hw                  # AdaptiveAvgPool2d(1)
            # F.normalize(features), eps = 1e-12 (rsqrt -> EUP slot)
            sq = jnp.sum(pooled * pooled, axis=-1, keepdims=True)
            feat = pooled * jax.lax.rsqrt(jnp.maximum(sq, NORM_EPS * NORM_EPS))
            # dropout(p=0.0) == identity; fc: bf16 weights, f32 accumulation
            h = jnp.dot(feat.astype(jnp.bfloat16), wfc_ref[...],
                        preferred_element_type=jnp.float32) + bfc_ref[...]
            # BatchNorm1d (eval, mean=0 var=1 gamma=1 beta=0): y = h/sqrt(1+eps)
            # is a uniform positive scale that cancels under the L2 normalize
            # below -> intentionally omitted (dead work).
            sq2 = jnp.sum(h * h, axis=-1, keepdims=True)
            fhat = h * jax.lax.rsqrt(jnp.maximum(sq2, NORM_EPS * NORM_EPS))
            feat_ref[...] = fhat.astype(feat_ref.dtype)

        # ---- ArcMarginProduct on this tile of classes ----
        cos = jnp.dot(feat_ref[...], warc_ref[...],
                      preferred_element_type=jnp.float32)          # (B, TILE_N)
        cos = cos * invwn_ref[...]                                 # column scale 1/||w||

        # global class index of each lane in this tile
        col = jax.lax.broadcasted_iota(jnp.int32, cos.shape, 1) + j * tile_n
        one_hot = col == labels_ref[...]                           # (B, TILE_N) bool

        # phi only matters at the label column: gather those B cosines and do
        # the margin math on (B, 1) instead of the full (B, N_CLS) matrix.
        cos_lb = jnp.sum(jnp.where(one_hot, cos, 0.0), axis=-1, keepdims=True)
        sin_lb = jnp.sqrt(jnp.maximum(1.0 - cos_lb * cos_lb, 0.0))
        phi_lb = cos_lb * COS_M - sin_lb * SIN_M
        phi_lb = jnp.where(cos_lb > TH, phi_lb, cos_lb - MM)       # easy_margin=False

        out_ref[...] = jnp.where(one_hot, phi_lb, cos) * S_SCALE

    return kernel


def shopee_forward(feat_map, w_fc, b_fc, w_arc, labels, *, tile_n=128):
    """feat_map: (B, C, H, W) backbone output; returns (B, N_CLS) arc logits."""
    B, C, H, W = feat_map.shape
    hw = H * W
    fc_dim = w_fc.shape[1]
    n_cls = w_arc.shape[0]
    n_pad = pl.cdiv(n_cls, tile_n) * tile_n

    # Layout: C on the lane axis (dense vregs; pool becomes a sublane reduce).
    x = feat_map.transpose(0, 2, 3, 1).reshape(B, hw, C)

    # bf16 weights for the MXU; f32 accumulation inside the kernel.
    w_fc_bf = w_fc.astype(jnp.bfloat16)
    b_fc2 = b_fc.reshape(1, fc_dim).astype(jnp.float32)

    # Pre-transpose ArcMargin weight, pad classes to a lane-dense multiple of
    # tile_n, and precompute per-class inverse norms (f32, from f32 weights).
    w_arc_f32 = w_arc.astype(jnp.float32)
    wn = jnp.sqrt(jnp.sum(w_arc_f32 * w_arc_f32, axis=1))
    inv_wn = 1.0 / jnp.maximum(wn, NORM_EPS)
    inv_wn = jnp.pad(inv_wn, (0, n_pad - n_cls)).reshape(1, n_pad)
    w_arc_t = jnp.pad(w_arc_f32, ((0, n_pad - n_cls), (0, 0))).T.astype(jnp.bfloat16)

    labels2 = labels.reshape(B, 1).astype(jnp.int32)

    flops = 2 * B * hw * C + 2 * B * C * fc_dim + 2 * B * fc_dim * n_pad
    bytes_accessed = (B * hw * C * 4 + C * fc_dim * 2 + fc_dim * 4
                      + fc_dim * n_pad * 2 + n_pad * 4 + B * 4 + B * n_pad * 4)

    out = pl.pallas_call(
        _make_head_kernel(tile_n, 1.0 / hw),
        out_shape=jax.ShapeDtypeStruct((B, n_pad), jnp.float32),
        grid=(n_pad // tile_n,),
        in_specs=[
            pl.BlockSpec((B, hw, C), lambda j: (0, 0, 0)),       # feature map (resident)
            pl.BlockSpec((C, fc_dim), lambda j: (0, 0)),         # fc weight (resident)
            pl.BlockSpec((1, fc_dim), lambda j: (0, 0)),         # fc bias
            pl.BlockSpec((fc_dim, tile_n), lambda j: (0, j)),    # arc weight tile (streamed)
            pl.BlockSpec((1, tile_n), lambda j: (0, j)),         # 1/||w|| tile
            pl.BlockSpec((B, 1), lambda j: (0, 0)),              # labels
        ],
        out_specs=pl.BlockSpec((B, tile_n), lambda j: (0, j)),
        scratch_shapes=[pltpu.VMEM((B, fc_dim), jnp.bfloat16)],
        compiler_params=pltpu.CompilerParams(
            dimension_semantics=("arbitrary",)),  # scratch feat carried across tiles
        cost_estimate=pl.CostEstimate(flops=flops, transcendentals=4 * B,
                                      bytes_accessed=bytes_accessed),
    )(x, w_fc_bf, b_fc2, w_arc_t, inv_wn, labels2)

    return out[:, :n_cls]


def _reference(feat_map, w_fc, b_fc, w_arc, labels):
    """Pure-JAX f32 reference of the PyTorch head forward."""
    pooled = jnp.mean(feat_map.astype(jnp.float32), axis=(2, 3))
    feat = pooled / jnp.maximum(
        jnp.linalg.norm(pooled, axis=-1, keepdims=True), NORM_EPS)
    h = feat @ w_fc + b_fc
    h = h / math.sqrt(1.0 + BN_EPS)  # BatchNorm1d eval w/ fresh stats
    fhat = h / jnp.maximum(jnp.linalg.norm(h, axis=-1, keepdims=True), NORM_EPS)
    what = w_arc / jnp.maximum(
        jnp.linalg.norm(w_arc, axis=-1, keepdims=True), NORM_EPS)
    cos = fhat @ what.T
    sin = jnp.sqrt(jnp.clip(1.0 - cos * cos, 0.0, None))
    phi = cos * COS_M - sin * SIN_M
    phi = jnp.where(cos > TH, phi, cos - MM)
    oh = jax.nn.one_hot(labels, w_arc.shape[0], dtype=cos.dtype)
    return (oh * phi + (1.0 - oh) * cos) * S_SCALE


if __name__ == "__main__":
    # Small synthetic shapes consistent with the nfnet head path:
    # backbone feature map -> pool -> normalize -> fc(512) -> bn -> arcmargin
    B, C, H, W = 8, 256, 8, 8
    FC_DIM = 512     # CFG.fc_dim
    N_CLS = 200      # out_feature (exercises class-tile padding: 200 -> 256)

    key = jax.random.PRNGKey(0)
    k1, k2, k3, k4 = jax.random.split(key, 4)

    feat_map = jax.random.normal(k1, (B, C, H, W), jnp.float32)

    # fc: xavier_normal_ weight stored transposed as (C, FC_DIM), bias = 0
    w_fc = jax.random.normal(k2, (C, FC_DIM), jnp.float32) * math.sqrt(2.0 / (C + FC_DIM))
    b_fc = jnp.zeros((FC_DIM,), jnp.float32)

    # ArcMargin: xavier_uniform_ weight, PyTorch layout (out_features, in_features)
    limit = math.sqrt(6.0 / (FC_DIM + N_CLS))
    w_arc = jax.random.uniform(k3, (N_CLS, FC_DIM), jnp.float32, -limit, limit)

    labels = jax.random.randint(k4, (B,), 0, N_CLS)

    out = shopee_forward(feat_map, w_fc, b_fc, w_arc, labels)
    out = jax.block_until_ready(out)

    assert out.shape == (B, N_CLS) and out.dtype == jnp.float32

    ref = _reference(feat_map, w_fc, b_fc, w_arc, labels)
    err = float(jnp.max(jnp.abs(out - ref)))
    assert err < 0.25, f"max abs err vs f32 reference too large: {err}"

    print("KERNEL_OK")
</pallas_src>

<mosaic_0001>
module attributes {stable_mosaic.version = 11 : i64} {
  func.func @kernel(%arg0: i32, %arg1: memref<8x64x256xf32, #tpu.memory_space<vmem>>, %arg2: memref<256x512xbf16, #tpu.memory_space<vmem>>, %arg3: memref<1x512xf32, #tpu.memory_space<vmem>>, %arg4: memref<512x128xbf16, #tpu.memory_space<vmem>>, %arg5: memref<1x128xf32, #tpu.memory_space<vmem>>, %arg6: memref<8x1xi32, #tpu.memory_space<vmem>>, %arg7: memref<8x128xf32, #tpu.memory_space<vmem>>, %arg8: memref<8x512xbf16, #tpu.memory_space<vmem>>) attributes {dimension_semantics = [#tpu.dimension_semantics<arbitrary>], iteration_bounds = array<i64: 2>, scalar_prefetch = 0 : i64, scratch_operands = 1 : i64, tpu.core_type = #tpu.core_type<tc>, window_params = [{pipeline_mode = #tpu.pipeline_mode<synchronous>, transform_indices = @transform_0, window_bounds = array<i64: 8, 64, 256>}, {pipeline_mode = #tpu.pipeline_mode<synchronous>, transform_indices = @transform_1, window_bounds = array<i64: 256, 512>}, {pipeline_mode = #tpu.pipeline_mode<synchronous>, transform_indices = @transform_2, window_bounds = array<i64: 1, 512>}, {transform_indices = @transform_3, window_bounds = array<i64: 512, 128>}, {transform_indices = @transform_4, window_bounds = array<i64: 1, 128>}, {pipeline_mode = #tpu.pipeline_mode<synchronous>, transform_indices = @transform_5, window_bounds = array<i64: 8, 1>}, {transform_indices = @transform_6, window_bounds = array<i64: 8, 128>}]} {
    %c0_i32 = arith.constant 0 : i32
    %0 = arith.cmpi eq, %arg0, %c0_i32 : i32
    %1 = arith.extui %0 : i1 to i32
    %c0_i32_0 = arith.constant 0 : i32
    %2 = arith.cmpi ne, %1, %c0_i32_0 : i32
    scf.if %2 {
      %c0_19 = arith.constant 0 : index
      %c0_20 = arith.constant 0 : index
      %c0_21 = arith.constant 0 : index
      %42 = vector.load %arg1[%c0_19, %c0_20, %c0_21] : memref<8x64x256xf32, #tpu.memory_space<vmem>>, vector<8x64x256xf32>
      %cst_22 = arith.constant dense<0.000000e+00> : vector<8x256xf32>
      %43 = vector.multi_reduction <add>, %42, %cst_22 [1] : vector<8x64x256xf32> to vector<8x256xf32>
      %cst_23 = arith.constant 1.562500e-02 : f32
      %44 = vector.broadcast %cst_23 : f32 to vector<8x256xf32>
      %45 = arith.mulf %43, %44 : vector<8x256xf32>
      %46 = arith.mulf %45, %45 : vector<8x256xf32>
      %cst_24 = arith.constant dense<0.000000e+00> : vector<8xf32>
      %47 = vector.multi_reduction <add>, %46, %cst_24 [1] : vector<8x256xf32> to vector<8xf32>
      %48 = vector.shape_cast %47 : vector<8xf32> to vector<8x1xf32>
      %cst_25 = arith.constant 1.000000e-24 : f32
      %49 = vector.broadcast %cst_25 : f32 to vector<8x1xf32>
      %50 = arith.maximumf %48, %49 : vector<8x1xf32>
      %51 = math.rsqrt %50 : vector<8x1xf32>
      %52 = vector.broadcast %51 : vector<8x1xf32> to vector<8x256xf32>
      %53 = arith.mulf %45, %52 : vector<8x256xf32>
      %54 = arith.truncf %53 : vector<8x256xf32> to vector<8x256xbf16>
      %c0_26 = arith.constant 0 : index
      %c0_27 = arith.constant 0 : index
      %55 = vector.load %arg2[%c0_26, %c0_27] : memref<256x512xbf16, #tpu.memory_space<vmem>>, vector<256x512xbf16>
      %cst_28 = arith.constant dense<0.000000e+00> : vector<8x512xf32>
      %56 = tpu.matmul %54, %55, %cst_28 {dimension_numbers = #tpu.dot_dimension_numbers<[1], [0], [0], [1], [0, 0, 1, 1], [], []>} : vector<8x256xbf16>, vector<256x512xbf16>, vector<8x512xf32> -> vector<8x512xf32>
      %c0_29 = arith.constant 0 : index
      %c0_30 = arith.constant 0 : index
      %57 = vector.load %arg3[%c0_29, %c0_30] : memref<1x512xf32, #tpu.memory_space<vmem>>, vector<1x512xf32>
      %58 = vector.broadcast %57 : vector<1x512xf32> to vector<8x512xf32>
      %59 = arith.addf %56, %58 : vector<8x512xf32>
      %60 = arith.mulf %59, %59 : vector<8x512xf32>
      %cst_31 = arith.constant dense<0.000000e+00> : vector<8xf32>
      %61 = vector.multi_reduction <add>, %60, %cst_31 [1] : vector<8x512xf32> to vector<8xf32>
      %62 = vector.shape_cast %61 : vector<8xf32> to vector<8x1xf32>
      %cst_32 = arith.constant 1.000000e-24 : f32
      %63 = vector.broadcast %cst_32 : f32 to vector<8x1xf32>
      %64 = arith.maximumf %62, %63 : vector<8x1xf32>
      %65 = math.rsqrt %64 : vector<8x1xf32>
      %66 = vector.broadcast %65 : vector<8x1xf32> to vector<8x512xf32>
      %67 = arith.mulf %59, %66 : vector<8x512xf32>
      %68 = arith.truncf %67 : vector<8x512xf32> to vector<8x512xbf16>
      %c0_33 = arith.constant 0 : index
      %c0_34 = arith.constant 0 : index
      %69 = vector.load %arg8[%c0_33, %c0_34] : memref<8x512xbf16, #tpu.memory_space<vmem>>, vector<8x512xbf16>
      tpu.vector_store %arg8[%c0_33, %c0_34], %68 {strides = array<i32>} : memref<8x512xbf16, #tpu.memory_space<vmem>>, vector<8x512xbf16>,
    } else {
    }
    %c0 = arith.constant 0 : index
    %c0_1 = arith.constant 0 : index
    %3 = vector.load %arg8[%c0, %c0_1] : memref<8x512xbf16, #tpu.memory_space<vmem>>, vector<8x512xbf16>
    %c0_2 = arith.constant 0 : index
    %c0_3 = arith.constant 0 : index
    %4 = vector.load %arg4[%c0_2, %c0_3] : memref<512x128xbf16, #tpu.memory_space<vmem>>, vector<512x128xbf16>
    %cst = arith.constant dense<0.000000e+00> : vector<8x128xf32>
    %5 = tpu.matmul %3, %4, %cst {dimension_numbers = #tpu.dot_dimension_numbers<[1], [0], [0], [1], [0, 0, 1, 1], [], []>} : vector<8x512xbf16>, vector<512x128xbf16>, vector<8x128xf32> -> vector<8x128xf32>
    %c0_4 = arith.constant 0 : index
    %c0_5 = arith.constant 0 : index
    %6 = vector.load %arg5[%c0_4, %c0_5] : memref<1x128xf32, #tpu.memory_space<vmem>>, vector<1x128xf32>
    %7 = vector.broadcast %6 : vector<1x128xf32> to vector<8x128xf32>
    %8 = arith.mulf %5, %7 : vector<8x128xf32>
    %9 = tpu.iota {dimensions = array<i32: 1>} : vector<8x128xi32>
    %c128_i32 = arith.constant 128 : i32
    %10 = arith.muli %arg0, %c128_i32 : i32
    %11 = vector.broadcast %10 : i32 to vector<8x128xi32>
    %12 = arith.addi %9, %11 : vector<8x128xi32>
    %c0_6 = arith.constant 0 : index
    %c0_7 = arith.constant 0 : index
    %13 = vector.load %arg6[%c0_6, %c0_7] : memref<8x1xi32, #tpu.memory_space<vmem>>, vector<8x1xi32>
    %14 = vector.broadcast %13 : vector<8x1xi32> to vector<8x128xi32>
    %15 = arith.cmpi eq, %12, %14 : vector<8x128xi32>
    %cst_8 = arith.constant 0.000000e+00 : f32
    %16 = vector.broadcast %cst_8 : f32 to vector<8x128xf32>
    %17 = arith.select %15, %8, %16 : vector<8x128xi1>, vector<8x128xf32>
    %cst_9 = arith.constant dense<0.000000e+00> : vector<8xf32>
    %18 = vector.multi_reduction <add>, %17, %cst_9 [1] : vector<8x128xf32> to vector<8xf32>
    %19 = vector.shape_cast %18 : vector<8xf32> to vector<8x1xf32>
    %20 = arith.mulf %19, %19 : vector<8x1xf32>
    %cst_10 = arith.constant 1.000000e+00 : f32
    %21 = vector.broadcast %cst_10 : f32 to vector<8x1xf32>
    %22 = arith.subf %21, %20 : vector<8x1xf32>
    %cst_11 = arith.constant 0.000000e+00 : f32
    %23 = vector.broadcast %cst_11 : f32 to vector<8x1xf32>
    %24 = arith.maximumf %22, %23 : vector<8x1xf32>
    %25 = math.sqrt %24 : vector<8x1xf32>
    %cst_12 = arith.constant 0.87758255 : f32
    %26 = vector.broadcast %cst_12 : f32 to vector<8x1xf32>
    %27 = arith.mulf %19, %26 : vector<8x1xf32>
    %cst_13 = arith.constant 0.47942555 : f32
    %28 = vector.broadcast %cst_13 : f32 to vector<8x1xf32>
    %29 = arith.mulf %25, %28 : vector<8x1xf32>
    %30 = arith.subf %27, %29 : vector<8x1xf32>
    %cst_14 = arith.constant -0.87758255 : f32
    %31 = vector.broadcast %cst_14 : f32 to vector<8x1xf32>
    %32 = arith.cmpf ogt, %19, %31 : vector<8x1xf32>
    %cst_15 = arith.constant 0.239712775 : f32
    %33 = vector.broadcast %cst_15 : f32 to vector<8x1xf32>
    %34 = arith.subf %19, %33 : vector<8x1xf32>
    %35 = arith.select %32, %30, %34 : vector<8x1xi1>, vector<8x1xf32>
    %36 = vector.shape_cast %35 : vector<8x1xf32> to vector<8x1xf32>
    %37 = vector.broadcast %36 : vector<8x1xf32> to vector<8x128xf32>
    %38 = arith.select %15, %37, %8 : vector<8x128xi1>, vector<8x128xf32>
    %cst_16 = arith.constant 3.000000e+01 : f32
    %39 = vector.broadcast %cst_16 : f32 to vector<8x128xf32>
    %40 = arith.mulf %38, %39 : vector<8x128xf32>
    %c0_17 = arith.constant 0 : index
    %c0_18 = arith.constant 0 : index
    %41 = vector.load %arg7[%c0_17, %c0_18] : memref<8x128xf32, #tpu.memory_space<vmem>>, vector<8x128xf32>
    tpu.vector_store %arg7[%c0_17, %c0_18], %40 {strides = array<i32>} : memref<8x128xf32, #tpu.memory_space<vmem>>, vector<8x128xf32>,
    return
  }
  func.func @transform_0(%arg0: i32) -> (i32, i32, i32) {
    %c0_i32 = arith.constant 0 : i32
    %c0_i32_0 = arith.constant 0 : i32
    %c0_i32_1 = arith.constant 0 : i32
    %c0_i32_2 = arith.constant 0 : i32
    return %c0_i32, %c0_i32_0, %c0_i32_1 : i32, i32, i32
  }
  func.func @transform_1(%arg0: i32) -> (i32, i32) {
    %c0_i32 = arith.constant 0 : i32
    %c0_i32_0 = arith.constant 0 : i32
    %c0_i32_1 = arith.constant 0 : i32
    return %c0_i32, %c0_i32_0 : i32, i32
  }
  func.func @transform_2(%arg0: i32) -> (i32, i32) {
    %c0_i32 = arith.constant 0 : i32
    %c0_i32_0 = arith.constant 0 : i32
    %c0_i32_1 = arith.constant 0 : i32
    return %c0_i32, %c0_i32_0 : i32, i32
  }
  func.func @transform_3(%arg0: i32) -> (i32, i32) {
    %c0_i32 = arith.constant 0 : i32
    %c0_i32_0 = arith.constant 0 : i32
    return %c0_i32, %arg0 : i32, i32
  }
  func.func @transform_4(%arg0: i32) -> (i32, i32) {
    %c0_i32 = arith.constant 0 : i32
    %c0_i32_0 = arith.constant 0 : i32
    return %c0_i32, %arg0 : i32, i32
  }
  func.func @transform_5(%arg0: i32) -> (i32, i32) {
    %c0_i32 = arith.constant 0 : i32
    %c0_i32_0 = arith.constant 0 : i32
    %c0_i32_1 = arith.constant 0 : i32
    return %c0_i32, %c0_i32_0 : i32, i32
  }
  func.func @transform_6(%arg0: i32) -> (i32, i32) {
    %c0_i32 = arith.constant 0 : i32
    %c0_i32_0 = arith.constant 0 : i32
    return %c0_i32, %arg0 : i32, i32
  }
}

</mosaic_0001>

<bundles_post_ra>
// kernel: tpu_custom_call.1
= control target key start
LH: loop header
LB: loop body
LE: loop exit
PB: predicated region body
PF: predicated region fallthrough
CT: control target
= control target key end

     0   :  { %s2994_s0 = inlined_call_operand.hbm [shape: f32[8,64,256], index: 0, kind: input, shape index: {}]   ;;  %s2995_s1 = inlined_call_operand.hbm [shape: bf16[256,512], index: 1, kind: input, shape index: {}]   ;;  %s2996_s2 = inlined_call_operand.vmem [shape: f32[1,512], index: 2, kind: input, shape index: {}]   ;;  %s2997_s3 = inlined_call_operand.hbm [shape: bf16[512,256], index: 3, kind: input, shape index: {}]   ;;  %s2998_s4 = inlined_call_operand.vmem [shape: f32[1,256], index: 4, kind: input, shape index: {}]   ;;  %s2999_s5 = inlined_call_operand.vmem [shape: s32[8,1], index: 5, kind: input, shape index: {}]   ;;  %s3000_s6 = inlined_call_operand.hbm [shape: f32[8,256], index: 6, kind: output, shape index: {}]  }
   0x1   :  { %3005 = sst [smem:[#allocation18_spill]] %s2994_s0 }
   0x2   :  { %11 = vsyncpa [#allocation4], 0 }
   0x3   :  { %12 = vsyncpa [#allocation7], 0 }
   0x4   :  { %13 = vsyncpa [#allocation5], 0 }
   0x5   :  { %15 = vsyncpa [#allocation5 + $0x1], 0  ;;  %s2648_s21 = smov 0   ;;  %s2650_s22 = smov 0  }
   0x6   :  { %s2652_s23 = smov 0   ;;  %s2654_s24 = smov 0  }
   0x7 LB: > { %3006 = sst [smem:[#allocation14_spill]] %s2591_s21  ;;  %s2669_s25 = sadd.s32 4294967295, %s2603_s24   ;;  %s2603_s24 = sphi %s2654_s24, %s3021_s24   ;;  %s2599_s23 = sphi %s2652_s23, %s3025_s23   ;;  %s2595_s22 = sphi %s2650_s22, %s3024_s22   ;;  %s2591_s21 = sphi %s2648_s21, %s3023_s21  }
   0x8   : > { %s1859_s26 = sadd.s32 4294967294, %s2603_s24   ;;  %s2673_s27 = sadd.s32 1, %s2603_s24  }
   0x9   : > { %3007 = sst [smem:[#allocation15_spill]] %s2673_s27  ;;  %s91_s28 = sadd.s32 1, %s2599_s23 }
   0xa   : > { %s88_s29 = ssub.s32 %s2603_s24, %s2673_s27  ;;  %p98_p0 = scmp.ne.s32.totalorder %s2599_s23, %s2595_s22 }
   0xb   : > { %p89_p1 = scmp.eq.s32.totalorder %s88_s29, 0  ;;  %p99_p2 = scmp.eq.s32.totalorder %s2603_s24, 0 }
   0xc   : > { %p104_p3 = scmp.ne.s32.totalorder %s2595_s22, %s2591_s21  ;;  %p105_p4 = scmp.eq.s32.totalorder %s2669_s25, 0 }
   0xd   : > { %s2685_s30 = scalar_select %p89_p1, %s2599_s23, %s91_s28  }
   0xe   : > { %p2687_p5 = por %p99_p2, %p98_p0  ;;  %p2693_p6 = por %p105_p4, %p104_p3 }
   0xf   : > { %3008 = sst [smem:[#allocation16_spill]] %s2685_s30  ;;  %p175_p7 = scmp.eq.s32.totalorder %s2669_s25, 1 }
  0x10   : > { %p181_p8 = scmp.eq.s32.totalorder %s1859_s26, 1  ;;  %p1860_p9 = scmp.ge.s32.totalorder %s2603_s24, 1 }
  0x11   : > { %p188_p10 = scmp.lt.s32.totalorder %s2603_s24, 3  ;;  %p2700_p11 = por %p175_p7, %p98_p0 }
  0x12   : > { %p2704_p12 = por %p181_p8, %p104_p3  ;;  %s3015_s0 = sld [smem:[#allocation18_spill]] }
  0x13   : > { %p2708_p13 = pnand %p1860_p9, %p188_p10  ;;  %s2605_s15 = smov [#allocation3]  }
  0x14   : > { %s3012_s10 = scalar_select %p2704_p12, 1, 0 }
  0x15   : > { %p2370_p0 = pneg %p2708_p13  ;;  %s201_s16 = sshll.u32 %s2605_s15, 4  ;;  %s202_s16 = int_to_ptr.vmem [resolvable:$true] %s201_s16 }
  0x16   : > { %3013 = sst [smem:[#allocation17_spill]] %s3012_s10  ;;  %p2387_p7 = scmp.lt.s32.totalorder %s2603_s24, 2 }
  0x17   : > { %p2371_p2 = pnand %p2370_p0, %p105_p4  ;;  %s2606_s17 = smov 256  }
  0x18   : > { %s199_s14 = sshll.u32 %s3015_s0, 4  ;;  %s2607_s18 = smov 16   ;;  %s200_s14 = int_to_ptr.hbm [resolvable:$true] %s199_s14 }
  0x19   : > { %2373 = dma.hbm_to_vmem [thread:$0]  (!%p2371_p2), %s200_s14, 16384, %s202_s16, [#allocation4], %s2606_s17, %s2606_s17, %s2607_s18  }
  0x1a   : > { %p2724_p8 = pnand %p2387_p7, %p2687_p5  ;;  %s213_s28 = sshll.u32 %s2995_s1, 4  ;;  %s214_s28 = int_to_ptr.hbm [resolvable:$true] %s213_s28 }
  0x1b   : > { %s2608_s29 = smov [#allocation6]   ;;  %s235_s13 = sand.u32 1, %s2603_s24  }
  0x1c   : > { %s215_s12 = sshll.u32 %s2608_s29, 4  ;;  %s237_s15 = sand.u32 1, %s2599_s23   ;;  %s216_s12 = int_to_ptr.vmem [resolvable:$true] %s215_s12 }
  0x1d   : > { %2376 = dma.hbm_to_vmem [thread:$0]  (!%p2371_p2), %s214_s28, 8192, %s216_s12, [#allocation7], %s2606_s17, %s2606_s17, %s2607_s18  }
  0x1e   : > { %s1864_s0 = sshll.u32 %s237_s15, 8  ;;  %s1865_s30 = sshll.u32 %s2603_s24, 2 }
  0x1f   : > { %s243_s16 = scalar_lea.hbm %s2997_s3, %s1865_s30  ;;  %s239_s10 = scalar_lea.vmem [#allocation8], %s1864_s0 }
  0x20   : > { %s244_s27 = sshll.u32 %s243_s16, 4  ;;  %s246_s21 = sshll.u32 %s239_s10, 4  ;;  %s245_s27 = int_to_ptr.hbm [resolvable:$true] %s244_s27  ;;  %s247_s21 = int_to_ptr.vmem [resolvable:$true] %s246_s21 }
  0x21   : > { %s236_s20 = scalar_lea.sflag [#allocation4], %s235_s13  ;;  %s2499_s26 = sshra.s32 %s245_s27, 4  ;;  %s2500_s26 = int_to_ptr.hbm [resolvable:$true] %s2499_s26 }
  0x22   : > { %s2501_s29 = scalar_lea.hbm %s2500_s26, 256  ;;  %p2503_p9 = pneg %p2724_p8 }
  0x23   : > { %p2502_p5 = scmp.ne.s32.totalorder %s2500_s26, %s2501_s29  ;;  %s2506_s28 = scalar_lea.hbm %s2997_s3, 512 }
  0x24   : > { %p2507_p2 = scmp.lt.s32.totalorder %s2500_s26, %s2997_s3  ;;  %p2508_p7 = scmp.lt.s32.totalorder %s2506_s28, %s2501_s29 }
  0x25   : > { %p2504_p10 = pnand %p2503_p9, %p2502_p5 }
  0x26   : > { %p2509_p3 = por %p2508_p7, %p2507_p2 }
  0x27   : > { %p2505_p0 = pneg %p2504_p10 }
  0x29   : > { %p2510_p1 = pnand %p2509_p3, %p2505_p0 }
  0x2b   : > { %2513 = shalt.err (!%p2510_p1)
}
  0x2c   : > { %s2609_s0 = smov 128   ;;  %s2610_s10 = smov 64  }
  0x2d   : > { %s2611_s13 = smov 4   ;;  %264 = sbr.rel (%p2708_p13) target bundleno = 928 (0x3a0), region = 44 }
  0x2e   : > { %2380 = dma.hbm_to_vmem [thread:$0]  (!%p2724_p8), %s245_s27, 4096, %s247_s21, %s236_s20, %s2609_s0, %s2610_s10, %s2611_s13  }
  0x32   : > { %2574 = dma.done.wait (%p105_p4), [#allocation4], 16384  }
  0x33   : > { %2576 = vsyncadd (%p105_p4), [#allocation4], 4294950912 }
  0x34   : > { %2578 = dma.done.wait (%p105_p4), [#allocation7], 8192  }
  0x35   : > { %2580 = vsyncadd (%p105_p4), [#allocation7], 4294959104  ;;  %s276_s19 = sand.u32 1, %s2669_s25   ;;  %s2759_s21 = sand.u32 1, %s2595_s22  }
  0x36   : > { %s1869_s27 = sshll.u32 %s2759_s21, 8  ;;  %s277_s11 = scalar_lea.sflag [#allocation4], %s276_s19 }
  0x37   : > { %s2762_s15 = scalar_lea.vmem [#allocation8], %s1869_s27 }
  0x38   : > { %2582 = dma.done.wait (%p2693_p6), %s277_s11, 4096  }
  0x39   : > { %2584 = vsyncadd (%p2693_p6), %s277_s11, 4294963200  ;;  %s1870_s14 = sshll.u32 %s2759_s21, 3  ;;  %p313_p4 = scmp.lt.s32.totalorder %s2669_s25, 1 }
  0x3a   : > { %s2777_s29 = scalar_lea.vmem [#allocation9], %s1870_s14  ;;  %p3017_p13 = scmp.ne.s32.totalorder %s2669_s25, 0 }
  0x3b   : > { %s2771_s7 = scalar_select %p313_p4, %s2669_s25, 1 }
  0x3c   : > { %319 = sbr.rel (%p3017_p13) target bundleno = 601 (0x259), region = 60 }
  0x3d   : > { %s315_s26 = scalar_lea.vmem %s2998_s4, %s2771_s7 }
  0x41   : > { %v320_v0 = vld [vmem:[#allocation3] sm:$0xff]  ;;  %v321_v1 = vld [vmem:[#allocation3 + $0x8] sm:$0xff]  ;;  %v322_v2 = vld [vmem:[#allocation3 + $0x10] sm:$0xff]  ;;  %vm704_vm0 = vcmask 1041409   ;;  %vm706_vm1 = vcmask 1042434   ;;  %vm708_vm2 = vcmask 1043459  }
  0x42   : > { %v323_v3 = vld [vmem:[#allocation3 + $0x18] sm:$0xff]  ;;  %v324_v4 = vld [vmem:[#allocation3 + $0x20] sm:$0xff]  ;;  %v325_v5 = vld [vmem:[#allocation3 + $0x28] sm:$0xff]  ;;  %v448_v6 = vadd.f32 %v322_v2, %v320_v0  ;;  %vm710_vm3 = vcmask 1044484   ;;  %vm712_vm4 = vcmask 1045509   ;;  %vm714_vm5 = vcmask 1046534  }
  0x43   : > { %v326_v7 = vld [vmem:[#allocation3 + $0x30] sm:$0xff]  ;;  %v461_v8 = vadd.f32 %v323_v3, %v321_v1  ;;  %v327_v9 = vld [vmem:[#allocation3 + $0x38] sm:$0xff]  ;;  %v328_v11 = vld [vmem:[#allocation3 + $0x40] sm:$0xff]  ;;  %vm716_vm6 = vcmask 1047559  }
  0x44   : > { %v449_v10 = vadd.f32 %v448_v6, %v324_v4  ;;  %v329_v12 = vld [vmem:[#allocation3 + $0x48] sm:$0xff]  ;;  %v330_v13 = vld [vmem:[#allocation3 + $0x50] sm:$0xff]  ;;  %v331_v15 = vld [vmem:[#allocation3 + $0x58] sm:$0xff] }
  0x45   : > { %v462_v14 = vadd.f32 %v461_v8, %v325_v5  ;;  %v336_v16 = vld [vmem:[#allocation3 + $0x80] sm:$0xff]  ;;  %v337_v17 = vld [vmem:[#allocation3 + $0x88] sm:$0xff]  ;;  %v338_v19 = vld [vmem:[#allocation3 + $0x90] sm:$0xff] }
  0x46   : > { %v450_v18 = vadd.f32 %v449_v10, %v326_v7  ;;  %v339_v20 = vld [vmem:[#allocation3 + $0x98] sm:$0xff]  ;;  %v340_v21 = vld [vmem:[#allocation3 + $0xa0] sm:$0xff]  ;;  %v333_v24 = vld [vmem:[#allocation3 + $0x68] sm:$0xff]  ;;  %v474_v27 = vadd.f32 %v338_v19, %v336_v16 }
  0x47   : > { %v463_v22 = vadd.f32 %v462_v14, %v327_v9  ;;  %v332_v23 = vld [vmem:[#allocation3 + $0x60] sm:$0xff]  ;;  %v341_v25 = vld [vmem:[#allocation3 + $0xa8] sm:$0xff]  ;;  %v487_v28 = vadd.f32 %v339_v20, %v337_v17  ;;  %v334_v29 = vld [vmem:[#allocation3 + $0x70] sm:$0xff] }
  0x48   : > { %v451_v26 = vadd.f32 %v450_v18, %v328_v11  ;;  %v342_v30 = vld [vmem:[#allocation3 + $0xb0] sm:$0xff]  ;;  %v343_v31 = vld [vmem:[#allocation3 + $0xb8] sm:$0xff]  ;;  %v344_v34 = vld [vmem:[#allocation3 + $0xc0] sm:$0xff]  ;;  %v475_v37 = vadd.f32 %v474_v27, %v340_v21 }
  0x49   : > { %v464_v32 = vadd.f32 %v463_v22, %v329_v12  ;;  %v335_v33 = vld [vmem:[#allocation3 + $0x78] sm:$0xff]  ;;  %v345_v35 = vld [vmem:[#allocation3 + $0xc8] sm:$0xff]  ;;  %v488_v38 = vadd.f32 %v487_v28, %v341_v25  ;;  %v346_v39 = vld [vmem:[#allocation3 + $0xd0] sm:$0xff] }
  0x4a   : > { %v452_v36 = vadd.f32 %v451_v26, %v330_v13  ;;  %v347_v40 = vld [vmem:[#allocation3 + $0xd8] sm:$0xff]  ;;  %v352_v41 = vld [vmem:[#allocation3 + $0x100] sm:$0xff]  ;;  %v353_v43 = vld [vmem:[#allocation3 + $0x108] sm:$0xff]  ;;  %v476_v47 = vadd.f32 %v475_v37, %v342_v30 }
  0x4b   : > { %v465_v42 = vadd.f32 %v464_v32, %v331_v15  ;;  %v354_v44 = vld [vmem:[#allocation3 + $0x110] sm:$0xff]  ;;  %v355_v45 = vld [vmem:[#allocation3 + $0x118] sm:$0xff]  ;;  %v489_v48 = vadd.f32 %v488_v38, %v343_v31  ;;  %v348_v49 = vld [vmem:[#allocation3 + $0xe0] sm:$0xff] }
  0x4c   : > { %v453_v46 = vadd.f32 %v452_v36, %v332_v23  ;;  %v356_v50 = vld [vmem:[#allocation3 + $0x120] sm:$0xff]  ;;  %v357_v51 = vld [vmem:[#allocation3 + $0x128] sm:$0xff]  ;;  %v500_v53 = vadd.f32 %v354_v44, %v352_v41  ;;  %v513_v54 = vadd.f32 %v355_v45, %v353_v43  ;;  %v358_v56 = vld [vmem:[#allocation3 + $0x130] sm:$0xff]  ;;  %v477_v59 = vadd.f32 %v476_v47, %v344_v34 }
  0x4d   : > { %v466_v52 = vadd.f32 %v465_v42, %v333_v24  ;;  %v349_v55 = vld [vmem:[#allocation3 + $0xe8] sm:$0xff]  ;;  %v359_v57 = vld [vmem:[#allocation3 + $0x138] sm:$0xff]  ;;  %v490_v60 = vadd.f32 %v489_v48, %v345_v35  ;;  %v350_v61 = vld [vmem:[#allocation3 + $0xf0] sm:$0xff] }
  0x4e   : > { %v454_v58 = vadd.f32 %v453_v46, %v334_v29  ;;  %v351_v62 = vld [vmem:[#allocation3 + $0xf8] sm:$0xff]  ;;  %v360_v63 = vld [vmem:[#allocation3 + $0x140] sm:$0xff]  ;;  %v501_v1 = vadd.f32 %v500_v53, %v356_v50  ;;  %v514_v2 = vadd.f32 %v513_v54, %v357_v51  ;;  %v361_v3 = vld [vmem:[#allocation3 + $0x148] sm:$0xff]  ;;  %v478_v7 = vadd.f32 %v477_v59, %v346_v39 }
  0x4f   : > { %v467_v0 = vadd.f32 %v466_v52, %v335_v33  ;;  %v362_v4 = vld [vmem:[#allocation3 + $0x150] sm:$0xff]  ;;  %v363_v5 = vld [vmem:[#allocation3 + $0x158] sm:$0xff]  ;;  %v491_v8 = vadd.f32 %v490_v60, %v347_v40  ;;  %v368_v9 = vld [vmem:[#allocation3 + $0x180] sm:$0xff] }
  0x50   : > { %v455_v6 = vrot.slane %v454_v58, 4  ;;  %v369_v10 = vld [vmem:[#allocation3 + $0x188] sm:$0xff]  ;;  %v370_v11 = vld [vmem:[#allocation3 + $0x190] sm:$0xff]  ;;  %v502_v13 = vadd.f32 %v501_v1, %v358_v56  ;;  %v515_v14 = vadd.f32 %v514_v2, %v359_v57  ;;  %v371_v15 = vld [vmem:[#allocation3 + $0x198] sm:$0xff]  ;;  %v479_v19 = vadd.f32 %v478_v7, %v348_v49 }
  0x51   : > { %v468_v12 = vrot.slane %v467_v0, 4  ;;  %v372_v16 = vld [vmem:[#allocation3 + $0x1a0] sm:$0xff]  ;;  %v373_v17 = vld [vmem:[#allocation3 + $0x1a8] sm:$0xff]  ;;  %v492_v20 = vadd.f32 %v491_v8, %v349_v55  ;;  %v526_v21 = vadd.f32 %v370_v11, %v368_v9  ;;  %v374_v22 = vld [vmem:[#allocation3 + $0x1b0] sm:$0xff]  ;;  %v539_v26 = vadd.f32 %v371_v15, %v369_v10 }
  0x52   : > { %v456_v18 = vadd.f32 %v455_v6, %v454_v58  ;;  %v503_v24 = vadd.f32 %v502_v13, %v360_v63  ;;  %v516_v25 = vadd.f32 %v515_v14, %v361_v3  ;;  %v364_v27 = vld [vmem:[#allocation3 + $0x160] sm:$0xff]  ;;  %v365_v28 = vld [vmem:[#allocation3 + $0x168] sm:$0xff]  ;;  %v375_v29 = vld [vmem:[#allocation3 + $0x1b8] sm:$0xff]  ;;  %v480_v31 = vadd.f32 %v479_v19, %v350_v61 }
  0x53   : > { %v469_v23 = vadd.f32 %v468_v12, %v467_v0  ;;  %v493_v32 = vadd.f32 %v492_v20, %v351_v62  ;;  %v527_v33 = vadd.f32 %v526_v21, %v372_v16  ;;  %v376_v34 = vld [vmem:[#allocation3 + $0x1c0] sm:$0xff]  ;;  %v540_v38 = vadd.f32 %v539_v26, %v373_v17  ;;  %v366_v39 = vld [vmem:[#allocation3 + $0x170] sm:$0xff]  ;;  %v367_v40 = vld [vmem:[#allocation3 + $0x178] sm:$0xff] }
  0x54   : > { %v457_v30 = vrot.slane %v456_v18, 2  ;;  %v504_v36 = vadd.f32 %v503_v24, %v362_v4  ;;  %v517_v37 = vadd.f32 %v516_v25, %v363_v5  ;;  %v377_v41 = vld [vmem:[#allocation3 + $0x1c8] sm:$0xff]  ;;  %v481_v43 = vrot.slane %v480_v31, 4  ;;  %v378_v46 = vld [vmem:[#allocation3 + $0x1d0] sm:$0xff]  ;;  %v379_v51 = vld [vmem:[#allocation3 + $0x1d8] sm:$0xff] }
  0x55   : > { %v470_v35 = vrot.slane %v469_v23, 2  ;;  %v494_v44 = vrot.slane %v493_v32, 4  ;;  %v528_v45 = vadd.f32 %v527_v33, %v374_v22  ;;  %v541_v50 = vadd.f32 %v540_v38, %v375_v29  ;;  %v380_v56 = vld [vmem:[#allocation3 + $0x1e0] sm:$0xff]  ;;  %v386_v58 = vld [vmem:[#allocation3 + $0x210] sm:$0xff]  ;;  %v381_v63 = vld [vmem:[#allocation3 + $0x1e8] sm:$0xff] }
  0x56   : > { %v458_v42 = vadd.f32 %v457_v30, %v456_v18  ;;  %v505_v48 = vadd.f32 %v504_v36, %v364_v27  ;;  %v518_v49 = vadd.f32 %v517_v37, %v365_v28  ;;  %v482_v53 = vadd.f32 %v481_v43, %v480_v31  ;;  %v384_v57 = vld [vmem:[#allocation3 + $0x200] sm:$0xff]  ;;  %v385_v0 = vld [vmem:[#allocation3 + $0x208] sm:$0xff]  ;;  %v387_v1 = vld [vmem:[#allocation3 + $0x218] sm:$0xff] }
  0x57   : > { %v471_v47 = vadd.f32 %v470_v35, %v469_v23  ;;  %v495_v54 = vadd.f32 %v494_v44, %v493_v32  ;;  %v529_v55 = vadd.f32 %v528_v45, %v376_v34  ;;  %v542_v62 = vadd.f32 %v541_v50, %v377_v41  ;;  %v382_v6 = vld [vmem:[#allocation3 + $0x1f0] sm:$0xff]  ;;  %v388_v7 = vld [vmem:[#allocation3 + $0x220] sm:$0xff]  ;;  %v383_v12 = vld [vmem:[#allocation3 + $0x1f8] sm:$0xff] }
  0x58   : > { %v459_v52 = vrot.slane %v458_v42, 1  ;;  %v506_v60 = vadd.f32 %v505_v48, %v366_v39  ;;  %v519_v61 = vadd.f32 %v518_v49, %v367_v40  ;;  %v483_v3 = vrot.slane %v482_v53, 2  ;;  %v389_v13 = vld [vmem:[#allocation3 + $0x228] sm:$0xff]  ;;  %v390_v18 = vld [vmem:[#allocation3 + $0x230] sm:$0xff]  ;;  %v391_v23 = vld [vmem:[#allocation3 + $0x238] sm:$0xff] }
  0x59   : > { %v472_v59 = vrot.slane %v471_v47, 1  ;;  %v496_v4 = vrot.slane %v495_v54, 2  ;;  %v530_v5 = vadd.f32 %v529_v55, %v378_v46  ;;  %v543_v11 = vadd.f32 %v542_v62, %v379_v51  ;;  %v392_v24 = vld [vmem:[#allocation3 + $0x240] sm:$0xff]  ;;  %v401_v30 = vld [vmem:[#allocation3 + $0x288] sm:$0xff]  ;;  %v402_v31 = vld [vmem:[#allocation3 + $0x290] sm:$0xff] }
  0x5a   : > { %v2781_v2 = vadd.f32 %v459_v52, %v458_v42  ;;  %v507_v9 = vrot.slane %v506_v60, 4  ;;  %v520_v10 = vrot.slane %v519_v61, 4  ;;  %v484_v14 = vadd.f32 %v483_v3, %v482_v53  ;;  %v400_v25 = vld [vmem:[#allocation3 + $0x280] sm:$0xff]  ;;  %v403_v32 = vld [vmem:[#allocation3 + $0x298] sm:$0xff]  ;;  %v393_v37 = vld [vmem:[#allocation3 + $0x248] sm:$0xff] }
  0x5b   : > { %v2783_v8 = vadd.f32 %v472_v59, %v471_v47  ;;  %v497_v15 = vadd.f32 %v496_v4, %v495_v54  ;;  %v531_v16 = vadd.f32 %v530_v5, %v380_v56  ;;  %v552_v17 = vadd.f32 %v386_v58, %v384_v57  ;;  %v394_v42 = vld [vmem:[#allocation3 + $0x250] sm:$0xff]  ;;  %v404_v43 = vld [vmem:[#allocation3 + $0x2a0] sm:$0xff]  ;;  %v405_v44 = vld [vmem:[#allocation3 + $0x2a8] sm:$0xff] }
  0x5c   : > { %v508_v19 = vadd.f32 %v507_v9, %v506_v60  ;;  %v521_v20 = vadd.f32 %v520_v10, %v519_v61  ;;  %v544_v21 = vadd.f32 %v543_v11, %v381_v63  ;;  %v565_v22 = vadd.f32 %v387_v1, %v385_v0  ;;  %v395_v49 = vld [vmem:[#allocation3 + $0x258] sm:$0xff]  ;;  %v396_v50 = vld [vmem:[#allocation3 + $0x260] sm:$0xff]  ;;  %v397_v51 = vld [vmem:[#allocation3 + $0x268] sm:$0xff] }
  0x5d   : > { %v485_v26 = vrot.slane %v484_v14, 1  ;;  %v498_v27 = vrot.slane %v497_v15, 1  ;;  %v532_v28 = vadd.f32 %v531_v16, %v382_v6  ;;  %v553_v29 = vadd.f32 %v552_v17, %v388_v7  ;;  %v406_v56 = vld [vmem:[#allocation3 + $0x2b0] sm:$0xff]  ;;  %v407_v57 = vld [vmem:[#allocation3 + $0x2b8] sm:$0xff]  ;;  %v416_v58 = vld [vmem:[#allocation3 + $0x300] sm:$0xff] }
  0x5e   : > { %v509_v33 = vrot.slane %v508_v19, 2  ;;  %v522_v34 = vrot.slane %v521_v20, 2  ;;  %v545_v35 = vadd.f32 %v544_v21, %v383_v12  ;;  %v566_v36 = vadd.f32 %v565_v22, %v389_v13  ;;  %v417_v63 = vld [vmem:[#allocation3 + $0x308] sm:$0xff]  ;;  %v418_v0 = vld [vmem:[#allocation3 + $0x310] sm:$0xff]  ;;  %v419_v1 = vld [vmem:[#allocation3 + $0x318] sm:$0xff] }
  0x5f   : > { %v2785_v38 = vadd.f32 %v485_v26, %v484_v14  ;;  %v2787_v39 = vadd.f32 %v498_v27, %v497_v15  ;;  %v533_v40 = vrot.slane %v532_v28, 4  ;;  %v554_v41 = vadd.f32 %v553_v29, %v390_v18  ;;  %v398_v7 = vld [vmem:[#allocation3 + $0x270] sm:$0xff]  ;;  %v408_v9 = vld [vmem:[#allocation3 + $0x2c0] sm:$0xff]  ;;  %v409_v10 = vld [vmem:[#allocation3 + $0x2c8] sm:$0xff] }
  0x60   : > { %v510_v45 = vadd.f32 %v509_v33, %v508_v19  ;;  %v523_v46 = vadd.f32 %v522_v34, %v521_v20  ;;  %v546_v47 = vrot.slane %v545_v35, 4  ;;  %v567_v48 = vadd.f32 %v566_v36, %v391_v23  ;;  %v399_v15 = vld [vmem:[#allocation3 + $0x278] sm:$0xff]  ;;  %v420_v16 = vld [vmem:[#allocation3 + $0x320] sm:$0xff]  ;;  %v421_v17 = vld [vmem:[#allocation3 + $0x328] sm:$0xff] }
  0x61   : > { %v534_v52 = vadd.f32 %v533_v40, %v532_v28  ;;  %v555_v53 = vadd.f32 %v554_v41, %v392_v24  ;;  %v578_v54 = vadd.f32 %v402_v31, %v400_v25  ;;  %v591_v55 = vadd.f32 %v403_v32, %v401_v30  ;;  %v410_v22 = vld [vmem:[#allocation3 + $0x2d0] sm:$0xff]  ;;  %v411_v23 = vld [vmem:[#allocation3 + $0x2d8] sm:$0xff]  ;;  %v412_v24 = vld [vmem:[#allocation3 + $0x2e0] sm:$0xff] }
  0x62   : > { %v511_v59 = vrot.slane %v510_v45, 1  ;;  %v524_v60 = vrot.slane %v523_v46, 1  ;;  %v547_v61 = vadd.f32 %v546_v47, %v545_v35  ;;  %v568_v62 = vadd.f32 %v567_v48, %v393_v37  ;;  %v413_v29 = vld [vmem:[#allocation3 + $0x2e8] sm:$0xff]  ;;  %v422_v30 = vld [vmem:[#allocation3 + $0x330] sm:$0xff]  ;;  %v423_v31 = vld [vmem:[#allocation3 + $0x338] sm:$0xff] }
  0x63   : > { %v535_v3 = vrot.slane %v534_v52, 2  ;;  %v556_v4 = vadd.f32 %v555_v53, %v394_v42  ;;  %v579_v5 = vadd.f32 %v578_v54, %v404_v43  ;;  %v592_v6 = vadd.f32 %v591_v55, %v405_v44  ;;  %v424_v36 = vld [vmem:[#allocation3 + $0x340] sm:$0xff]  ;;  %v434_v40 = vld [vmem:[#allocation3 + $0x390] sm:$0xff]  ;;  %v435_v47 = vld [vmem:[#allocation3 + $0x398] sm:$0xff] }
  0x64   : > { %v2789_v11 = vadd.f32 %v511_v59, %v510_v45  ;;  %v2791_v12 = vadd.f32 %v524_v60, %v523_v46  ;;  %v548_v13 = vrot.slane %v547_v61, 2  ;;  %v569_v14 = vadd.f32 %v568_v62, %v395_v49  ;;  %v432_v37 = vld [vmem:[#allocation3 + $0x380] sm:$0xff]  ;;  %v425_v45 = vld [vmem:[#allocation3 + $0x348] sm:$0xff]  ;;  %v415_v53 = vld [vmem:[#allocation3 + $0x2f8] sm:$0xff] }
  0x65   : > { %v536_v18 = vadd.f32 %v535_v3, %v534_v52  ;;  %v557_v19 = vadd.f32 %v556_v4, %v396_v50  ;;  %v580_v20 = vadd.f32 %v579_v5, %v406_v56  ;;  %v593_v21 = vadd.f32 %v592_v6, %v407_v57  ;;  %v433_v46 = vld [vmem:[#allocation3 + $0x388] sm:$0xff]  ;;  %v414_v52 = vld [vmem:[#allocation3 + $0x2f0] sm:$0xff]  ;;  %v436_v54 = vld [vmem:[#allocation3 + $0x3a0] sm:$0xff] }
  0x66   : > { %v549_v25 = vadd.f32 %v548_v13, %v547_v61  ;;  %v570_v26 = vadd.f32 %v569_v14, %v397_v51  ;;  %v604_v27 = vadd.f32 %v418_v0, %v416_v58  ;;  %v617_v28 = vadd.f32 %v419_v1, %v417_v63  ;;  %v426_v59 = vld [vmem:[#allocation3 + $0x350] sm:$0xff]  ;;  %v427_v60 = vld [vmem:[#allocation3 + $0x358] sm:$0xff]  ;;  %v437_v61 = vld [vmem:[#allocation3 + $0x3a8] sm:$0xff] }
  0x67   : > { %v537_v32 = vrot.slane %v536_v18, 1  ;;  %v558_v33 = vadd.f32 %v557_v19, %v398_v7  ;;  %v581_v34 = vadd.f32 %v580_v20, %v408_v9  ;;  %v594_v35 = vadd.f32 %v593_v21, %v409_v10  ;;  %v438_v3 = vld [vmem:[#allocation3 + $0x3b0] sm:$0xff]  ;;  %v428_v9 = vld [vmem:[#allocation3 + $0x360] sm:$0xff]  ;;  %v429_v10 = vld [vmem:[#allocation3 + $0x368] sm:$0xff] }
  0x68   : > { %v550_v41 = vrot.slane %v549_v25, 1  ;;  %v571_v42 = vadd.f32 %v570_v26, %v399_v15  ;;  %v605_v43 = vadd.f32 %v604_v27, %v420_v16  ;;  %v618_v44 = vadd.f32 %v617_v28, %v421_v17  ;;  %v439_v13 = vld [vmem:[#allocation3 + $0x3b8] sm:$0xff] }
  0x69   : > { %v2793_v48 = vadd.f32 %v537_v32, %v536_v18  ;;  %v559_v49 = vrot.slane %v558_v33, 4  ;;  %v582_v50 = vadd.f32 %v581_v34, %v410_v22  ;;  %v595_v51 = vadd.f32 %v594_v35, %v411_v23  ;;  %v440_v18 = vld [vmem:[#allocation3 + $0x3c0] sm:$0xff]  ;;  %v430_v23 = vld [vmem:[#allocation3 + $0x370] sm:$0xff]  ;;  %v443_v35 = vld [vmem:[#allocation3 + $0x3d8] sm:$0xff] }
  0x6a   : > { %v2795_v55 = vadd.f32 %v550_v41, %v549_v25  ;;  %v572_v56 = vrot.slane %v571_v42, 4  ;;  %v606_v57 = vadd.f32 %v605_v43, %v422_v30  ;;  %v619_v58 = vadd.f32 %v618_v44, %v423_v31  ;;  %v441_v25 = vld [vmem:[#allocation3 + $0x3c8] sm:$0xff]  ;;  %v442_v30 = vld [vmem:[#allocation3 + $0x3d0] sm:$0xff] }
  0x6b   : > { %v560_v62 = vadd.f32 %v559_v49, %v558_v33  ;;  %v583_v63 = vadd.f32 %v582_v50, %v412_v24  ;;  %v596_v0 = vadd.f32 %v595_v51, %v413_v29  ;;  %v630_v1 = vadd.f32 %v434_v40, %v432_v37  ;;  %v431_v24 = vld [vmem:[#allocation3 + $0x378] sm:$0xff] }
  0x6c   : > { %v573_v4 = vadd.f32 %v572_v56, %v571_v42  ;;  %v607_v5 = vadd.f32 %v606_v57, %v424_v36  ;;  %v620_v6 = vadd.f32 %v619_v58, %v425_v45  ;;  %v643_v7 = vadd.f32 %v435_v47, %v433_v46  ;;  %v444_v42 = vld [vmem:[#allocation3 + $0x3e0] sm:$0xff]  ;;  %v445_v47 = vld [vmem:[#allocation3 + $0x3e8] sm:$0xff] }
  0x6d   : > { %v561_v14 = vrot.slane %v560_v62, 2  ;;  %v584_v15 = vadd.f32 %v583_v63, %v414_v52  ;;  %v597_v16 = vadd.f32 %v596_v0, %v415_v53  ;;  %v631_v17 = vadd.f32 %v630_v1, %v436_v54  ;;  %v446_v53 = vld [vmem:[#allocation3 + $0x3f0] sm:$0xff] }
  0x6e   : > { %v574_v19 = vrot.slane %v573_v4, 2  ;;  %v608_v20 = vadd.f32 %v607_v5, %v426_v59  ;;  %v621_v21 = vadd.f32 %v620_v6, %v427_v60  ;;  %v644_v22 = vadd.f32 %v643_v7, %v437_v61  ;;  %v447_v59 = vld [vmem:[#allocation3 + $0x3f8] sm:$0xff] }
  0x6f   : > { %v562_v26 = vadd.f32 %v561_v14, %v560_v62  ;;  %v585_v27 = vrot.slane %v584_v15, 4  ;;  %v598_v28 = vrot.slane %v597_v16, 4  ;;  %v632_v29 = vadd.f32 %v631_v17, %v438_v3 }
  0x70   : > { %v575_v31 = vadd.f32 %v574_v19, %v573_v4  ;;  %v609_v32 = vadd.f32 %v608_v20, %v428_v9  ;;  %v622_v33 = vadd.f32 %v621_v21, %v429_v10  ;;  %v645_v34 = vadd.f32 %v644_v22, %v439_v13 }
  0x71   : > { %v563_v36 = vrot.slane %v562_v26, 1  ;;  %v586_v37 = vadd.f32 %v585_v27, %v584_v15  ;;  %v599_v40 = vadd.f32 %v598_v28, %v597_v16  ;;  %v633_v41 = vadd.f32 %v632_v29, %v440_v18 }
  0x72   : > { %v576_v43 = vrot.slane %v575_v31, 1  ;;  %v610_v44 = vadd.f32 %v609_v32, %v430_v23  ;;  %v623_v45 = vadd.f32 %v622_v33, %v431_v24  ;;  %v646_v46 = vadd.f32 %v645_v34, %v441_v25 }
  0x73   : > { %v564_v49 = vadd.f32 %v563_v36, %v562_v26  ;;  %v587_v50 = vrot.slane %v586_v37, 2  ;;  %v600_v51 = vrot.slane %v599_v40, 2  ;;  %v634_v52 = vadd.f32 %v633_v41, %v442_v30 }
  0x74   : > { %v577_v54 = vadd.f32 %v576_v43, %v575_v31  ;;  %v611_v56 = vrot.slane %v610_v44, 4  ;;  %v624_v57 = vrot.slane %v623_v45, 4  ;;  %v647_v58 = vadd.f32 %v646_v46, %v443_v35 }
  0x75   : > { %v588_v60 = vadd.f32 %v587_v50, %v586_v37  ;;  %v601_v61 = vadd.f32 %v600_v51, %v599_v40  ;;  %v635_v62 = vadd.f32 %v634_v52, %v444_v42  ;;  %v2798_v63 = vmul.f32 0.015625, %v2781_v2  ;;  %v1986_v51 = vld [vmem:[#allocation6 + $0xe0] sm:$0xf]  ;;  %v2292_v52 = vld [vmem:[#allocation6 + $0xec] sm:$0xf0] }
  0x76   : > { %v612_v0 = vadd.f32 %v611_v56, %v610_v44  ;;  %v625_v1 = vadd.f32 %v624_v57, %v623_v45  ;;  %v648_v3 = vadd.f32 %v647_v58, %v445_v47  ;;  %v2801_v4 = vmul.f32 0.015625, %v2783_v8  ;;  %v2114_v57 = vld [vmem:[#allocation6 + $0x1e0] sm:$0xf]  ;;  %v2324_v58 = vld [vmem:[#allocation6 + $0x1ec] sm:$0xf0] }
  0x77   : > { %v589_v5 = vrot.slane %v588_v60, 1  ;;  %v602_v6 = vrot.slane %v601_v61, 1  ;;  %v636_v7 = vadd.f32 %v635_v62, %v446_v53  ;;  %v2804_v9 = vmul.f32 0.015625, %v2785_v38  ;;  %v1988_v62 = vld [vmem:[#allocation6 + $0xf0] sm:$0xf0] }
  0x78   : > { %v613_v10 = vrot.slane %v612_v0, 2  ;;  %v626_v13 = vrot.slane %v625_v1, 2  ;;  %v649_v14 = vadd.f32 %v648_v3, %v447_v59  ;;  %v2807_v15 = vmul.f32 0.015625, %v2787_v39 }
  0x79   : > { %v590_v2 = vadd.f32 %v589_v5, %v588_v60  ;;  %v603_v16 = vadd.f32 %v602_v6, %v601_v61  ;;  %v637_v17 = vrot.slane %v636_v7, 4  ;;  %v2810_v18 = vmul.f32 0.015625, %v2789_v11  ;;  %v2290_v61 = vld [vmem:[#allocation6 + $0xe4] sm:$0xf]  ;;  %v1970_v6 = vld [vmem:[#allocation6 + $0xc0] sm:$0xf] }
  0x7a   : > { %v614_v8 = vadd.f32 %v613_v10, %v612_v0  ;;  %v627_v19 = vadd.f32 %v626_v13, %v625_v1  ;;  %v650_v20 = vrot.slane %v649_v14, 4  ;;  %v2813_v21 = vmul.f32 0.015625, %v2791_v12  ;;  %v2322_v0 = vld [vmem:[#allocation6 + $0x1e4] sm:$0xf]  ;;  %v2116_v1 = vld [vmem:[#allocation6 + $0x1f0] sm:$0xf0] }
  0x7b   : > { %v638_v38 = vadd.f32 %v637_v17, %v636_v7  ;;  %v2816_v22 = vmul.f32 0.015625, %v2793_v48  ;;  %v2819_v23 = vmul.f32 0.015625, %v2795_v55  ;;  %v2821_v39 = vmul.f32 0.015625, %v564_v49  ;;  %v2288_v13 = vld [vmem:[#allocation6 + $0xcc] sm:$0xf0] }
  0x7c   : > { %v615_v24 = vrot.slane %v614_v8, 1  ;;  %v628_v25 = vrot.slane %v627_v19, 1  ;;  %v651_v26 = vadd.f32 %v650_v20, %v649_v14  ;;  %v2823_v11 = vmul.f32 0.015625, %v577_v54  ;;  %v2286_v20 = vld [vmem:[#allocation6 + $0xc4] sm:$0xf] }
  0x7d   : > { %v639_v27 = vrot.slane %v638_v38, 2  ;;  %v2825_v28 = vmul.f32 0.015625, %v590_v2  ;;  %v2827_v29 = vmul.f32 0.015625, %v603_v16  ;;  %v672_v12 = vmul.f32 %v2798_v63, %v2798_v63 }
  0x7e   : > { %v616_v48 = vadd.f32 %v615_v24, %v614_v8  ;;  %v629_v30 = vadd.f32 %v628_v25, %v627_v19  ;;  %v652_v31 = vrot.slane %v651_v26, 2  ;;  %v673_v55 = vmul.f32 %v2801_v4, %v2801_v4  ;;  %v2098_v8 = vld [vmem:[#allocation6 + $0x1c0] sm:$0xf]  ;;  %v2320_v19 = vld [vmem:[#allocation6 + $0x1cc] sm:$0xf0] }
  0x7f   : > { %v640_v32 = vadd.f32 %v639_v27, %v638_v38  ;;  %v674_v33 = vmul.f32 %v2804_v9, %v2804_v9  ;;  %v675_v34 = vmul.f32 %v2807_v15, %v2807_v15  ;;  %v676_v35 = vmul.f32 %v2810_v18, %v2810_v18  ;;  %v1972_v27 = vld [vmem:[#allocation6 + $0xd0] sm:$0xf0] }
  0x80   : > { %v653_v36 = vadd.f32 %v652_v31, %v651_v26  ;;  %v2839_v37 = vmul.f32 0.015625, %v616_v48  ;;  %v2841_v40 = vmul.f32 0.015625, %v629_v30  ;;  %v677_v41 = vmul.f32 %v2813_v21, %v2813_v21  ;;  %v2100_v48 = vld [vmem:[#allocation6 + $0x1d0] sm:$0xf0] }
  0x81   : > { %v641_v42 = vrot.slane %v640_v32, 1  ;;  %v678_v43 = vmul.f32 %v2816_v22, %v2816_v22  ;;  %v679_v44 = vmul.f32 %v2819_v23, %v2819_v23  ;;  %v680_v45 = vmul.f32 %v2821_v39, %v2821_v39 }
  0x82   : > { %v654_v46 = vrot.slane %v653_v36, 1  ;;  %v681_v47 = vmul.f32 %v2823_v11, %v2823_v11  ;;  %v682_v49 = vmul.f32 %v2825_v28, %v2825_v28  ;;  %v683_v50 = vmul.f32 %v2827_v29, %v2827_v29 }
  0x83   : > { %v642_v53 = vadd.f32 %v641_v42, %v640_v32  ;;  %v684_v54 = vmul.f32 %v2839_v37, %v2839_v37  ;;  %v685_v56 = vmul.f32 %v2841_v40, %v2841_v40  ;;  %v705_v60 = vsel %vm704_vm0, %v674_v33, %v672_v12  ;;  %v2318_v12 = vld [vmem:[#allocation6 + $0x1c4] sm:$0xf] }
  0x84   : > { %v655_v59 = vadd.f32 %v654_v46, %v653_v36  ;;  %v707_v5 = vsel %vm706_vm1, %v676_v35, %v705_v60  ;;  %v718_v16 = vsel %vm704_vm0, %v675_v34, %v673_v55  ;;  %v1987_v17 = vor.u32 %v2292_v52, %v1986_v51  ;;  %v2082_v51 = vld [vmem:[#allocation6 + $0x1a0] sm:$0xf]  ;;  %v2084_v60 = vld [vmem:[#allocation6 + $0x1b0] sm:$0xf0] }
  0x85   : > { %v2862_v3 = vmul.f32 0.015625, %v642_v53  ;;  %v709_v10 = vsel %vm708_vm2, %v678_v43, %v707_v5  ;;  %v719_v25 = vsel %vm706_vm1, %v677_v41, %v718_v16  ;;  %v2115_v26 = vor.u32 %v2324_v58, %v2114_v57  ;;  %v2316_v53 = vld [vmem:[#allocation6 + $0x1ac] sm:$0xf0]  ;;  %v2068_v16 = vld [vmem:[#allocation6 + $0x190] sm:$0xf0] }
  0x86   : > { %v2865_v7 = vmul.f32 0.015625, %v655_v59  ;;  %v711_v2 = vsel %vm710_vm3, %v680_v45, %v709_v10  ;;  %v720_v31 = vsel %vm708_vm2, %v679_v44, %v719_v25  ;;  %1247 = vmatpush.bf16.msra.mxu0 %v1987_v17  ;;  %v1991_v55 = vor.u32 %v2290_v61, %v1988_v62  ;;  %v2314_v59 = vld [vmem:[#allocation6 + $0x1a4] sm:$0xf]  ;;  %v1938_v61 = vld [vmem:[#allocation6 + $0x80] sm:$0xf] }
  0x87   : > { %v686_v14 = vmul.f32 %v2862_v3, %v2862_v3  ;;  %v713_v24 = vsel %vm712_vm4, %v682_v49, %v711_v2  ;;  %v2119_v32 = vor.u32 %v2322_v0, %v2116_v1  ;;  %v721_v34 = vsel %vm710_vm3, %v681_v47, %v720_v31  ;;  %1260 = vmatpush.bf16.msra.mxu1 %v2115_v26  ;;  %v1954_v47 = vld [vmem:[#allocation6 + $0xa0] sm:$0xf]  ;;  %v2284_v49 = vld [vmem:[#allocation6 + $0xac] sm:$0xf0]  ;;  %v1940_v10 = vld [vmem:[#allocation6 + $0x90] sm:$0xf0] }
  0x88   : > { %v687_v38 = vmul.f32 %v2865_v7, %v2865_v7  ;;  %v715_v30 = vsel %vm714_vm5, %v684_v54, %v713_v24  ;;  %v1971_v35 = vor.u32 %v2288_v13, %v1970_v6  ;;  %v2099_v36 = vor.u32 %v2320_v19, %v2098_v8  ;;  %1273 = vmatpush.bf16.msra.mxu2 %v1991_v55  ;;  %v1956_v54 = vld [vmem:[#allocation6 + $0xb0] sm:$0xf0]  ;;  %v2280_v62 = vld [vmem:[#allocation6 + $0x8c] sm:$0xf0]  ;;  %v2066_v0 = vld [vmem:[#allocation6 + $0x180] sm:$0xf] }
  0x89   : > { %v717_v33 = vsel %vm716_vm6, %v686_v14, %v715_v30  ;;  %v722_v41 = vsel %vm712_vm4, %v683_v50, %v721_v34  ;;  %1286 = vmatpush.bf16.msra.mxu3 %v2119_v32  ;;  %v1975_v42 = vor.u32 %v2286_v20, %v1972_v27  ;;  %v2103_v43 = vor.u32 %v2318_v12, %v2100_v48  ;;  %v2282_v50 = vld [vmem:[#allocation6 + $0xa4] sm:$0xf]  ;;  %v2312_v5 = vld [vmem:[#allocation6 + $0x18c] sm:$0xf0]  ;;  %v1922_v8 = vld [vmem:[#allocation6 + $0x60] sm:$0xf] }
  0x8a   : > { %v723_v45 = vsel %vm714_vm5, %v685_v56, %v722_v41  ;;  %1248 = vmatpush.bf16.msra.mxu0 %v1971_v35  ;;  %v1955_v52 = vor.u32 %v2284_v49, %v1954_v47  ;;  %v2083_v57 = vor.u32 %v2316_v53, %v2082_v51  ;;  %v1959_v58 = vor.u32 %v2282_v50, %v1956_v54  ;;  %v2278_v6 = vld [vmem:[#allocation6 + $0x84] sm:$0xf]  ;;  %v2276_v19 = vld [vmem:[#allocation6 + $0x6c] sm:$0xf0]  ;;  %v2050_v20 = vld [vmem:[#allocation6 + $0x160] sm:$0xf] }
  0x8b   : > { %v724_v44 = vsel %vm716_vm6, %v687_v38, %v723_v45  ;;  %1261 = vmatpush.bf16.msra.mxu1 %v2099_v36  ;;  %v2087_v56 = vor.u32 %v2314_v59, %v2084_v60  ;;  %v1939_v1 = vor.u32 %v2280_v62, %v1938_v61  ;;  %v2067_v13 = vor.u32 %v2312_v5, %v2066_v0  ;;  %v2310_v2 = vld [vmem:[#allocation6 + $0x184] sm:$0xf]  ;;  %v2308_v24 = vld [vmem:[#allocation6 + $0x16c] sm:$0xf0]  ;;  %v1924_v26 = vld [vmem:[#allocation6 + $0x70] sm:$0xf0] }
  0x8c   : > { %v727_v46 = vadd.f32 %v724_v44, %v717_v33  ;;  %1274 = vmatpush.bf16.msra.mxu2 %v1975_v42  ;;  %v1943_v14 = vor.u32 %v2278_v6, %v1940_v10  ;;  %v2071_v17 = vor.u32 %v2310_v2, %v2068_v16  ;;  %v1923_v38 = vor.u32 %v2276_v19, %v1922_v8  ;;  %v2274_v25 = vld [vmem:[#allocation6 + $0x64] sm:$0xf]  ;;  %v2052_v30 = vld [vmem:[#allocation6 + $0x170] sm:$0xf0]  ;;  %v1906_v55 = vld [vmem:[#allocation6 + $0x40] sm:$0xf] }
  0x8d   : > { %1287 = vmatpush.bf16.msra.mxu3 %v2103_v43  ;;  %v2051_v27 = vor.u32 %v2308_v24, %v2050_v20  ;;  %v1927_v12 = vor.u32 %v2274_v25, %v1924_v26  ;;  %v2306_v48 = vld [vmem:[#allocation6 + $0x164] sm:$0xf]  ;;  %v2272_v32 = vld [vmem:[#allocation6 + $0x4c] sm:$0xf0]  ;;  %v2034_v33 = vld [vmem:[#allocation6 + $0x140] sm:$0xf] }
  0x8e   : > { %728 = vadd.xlane.f32.xlu0 %v727_v46  ;;  %1249 = vmatpush.bf16.msra.mxu0 %v1955_v52  ;;  %v2055_v31 = vor.u32 %v2306_v48, %v2052_v30  ;;  %v1907_v34 = vor.u32 %v2272_v32, %v1906_v55  ;;  %v2304_v35 = vld [vmem:[#allocation6 + $0x14c] sm:$0xf0]  ;;  %v2270_v36 = vld [vmem:[#allocation6 + $0x44] sm:$0xf]  ;;  %v1908_v41 = vld [vmem:[#allocation6 + $0x50] sm:$0xf0] }
  0x8f   : > { %1262 = vmatpush.bf16.msra.mxu1 %v2083_v57  ;;  %v2035_v42 = vor.u32 %v2304_v35, %v2034_v33  ;;  %v1911_v43 = vor.u32 %v2270_v36, %v1908_v41  ;;  %v2302_v45 = vld [vmem:[#allocation6 + $0x144] sm:$0xf]  ;;  %v2036_v44 = vld [vmem:[#allocation6 + $0x150] sm:$0xf0]  ;;  %v1890_v47 = vld [vmem:[#allocation6 + $0x20] sm:$0xf] }
  0x90   : > { %1275 = vmatpush.bf16.msra.mxu2 %v1959_v58  ;;  %v2039_v46 = vor.u32 %v2302_v45, %v2036_v44  ;;  %v2268_v49 = vld [vmem:[#allocation6 + $0x2c] sm:$0xf0]  ;;  %v2018_v51 = vld [vmem:[#allocation6 + $0x120] sm:$0xf]  ;;  %v2266_v50 = vld [vmem:[#allocation6 + $0x24] sm:$0xf] }
  0x91   : > { %1288 = vmatpush.bf16.msra.mxu3 %v2087_v56  ;;  %v1891_v52 = vor.u32 %v2268_v49, %v1890_v47  ;;  %v2300_v53 = vld [vmem:[#allocation6 + $0x12c] sm:$0xf0]  ;;  %v1892_v54 = vld [vmem:[#allocation6 + $0x30] sm:$0xf0]  ;;  %v2298_v59 = vld [vmem:[#allocation6 + $0x124] sm:$0xf] }
  0x92   : > { %1250 = vmatpush.bf16.msra.mxu0 %v1939_v1  ;;  %v2019_v57 = vor.u32 %v2300_v53, %v2018_v51  ;;  %v1895_v58 = vor.u32 %v2266_v50, %v1892_v54  ;;  %v2020_v60 = vld [vmem:[#allocation6 + $0x130] sm:$0xf0]  ;;  %v1874_v61 = vld [vmem:[#allocation6] sm:$0xf]  ;;  %v2264_v62 = vld [vmem:[#allocation6 + $0xc] sm:$0xf0] }
  0x93   : > { %1263 = vmatpush.bf16.msra.mxu1 %v2067_v13  ;;  %v2023_v56 = vor.u32 %v2298_v59, %v2020_v60  ;;  %v2002_v0 = vld [vmem:[#allocation6 + $0x100] sm:$0xf]  ;;  %v1875_v1 = vor.u32 %v2264_v62, %v1874_v61  ;;  %v2296_v5 = vld [vmem:[#allocation6 + $0x10c] sm:$0xf0]  ;;  %v2262_v6 = vld [vmem:[#allocation6 + $0x4] sm:$0xf] }
  0x94   : > { %1276 = vmatpush.bf16.msra.mxu2 %v1943_v14  ;;  %v1876_v10 = vld [vmem:[#allocation6 + $0x10] sm:$0xf0]  ;;  %v2003_v13 = vor.u32 %v2296_v5, %v2002_v0  ;;  %v2294_v2 = vld [vmem:[#allocation6 + $0x104] sm:$0xf]  ;;  %v2293_v19 = vld [vmem:[#allocation6 + $0xf4] sm:$0xf0] }
  0x95   : > { %1289 = vmatpush.bf16.msra.mxu3 %v2071_v17  ;;  %v1879_v14 = vor.u32 %v2262_v6, %v1876_v10  ;;  %v2004_v16 = vld [vmem:[#allocation6 + $0x110] sm:$0xf0]  ;;  %v1994_v17 = vld [vmem:[#allocation6 + $0xe8] sm:$0xf]  ;;  %v2291_v26 = vld [vmem:[#allocation6 + $0xec] sm:$0xf] }
  0x96   : > { %1251 = vmatpush.bf16.msra.mxu0 %v1923_v38  ;;  %v2007_v8 = vor.u32 %v2294_v2, %v2004_v16  ;;  %v2122_v20 = vld [vmem:[#allocation6 + $0x1e8] sm:$0xf]  ;;  %v2325_v38 = vld [vmem:[#allocation6 + $0x1f4] sm:$0xf0]  ;;  %v1995_v24 = vor.u32 %v2293_v19, %v1994_v17  ;;  %v2124_v30 = vld [vmem:[#allocation6 + $0x1f8] sm:$0xf0] }
  0x97   : > { %1264 = vmatpush.bf16.msra.mxu1 %v2051_v27  ;;  %v2123_v25 = vor.u32 %v2325_v38, %v2122_v20  ;;  %v1996_v27 = vld [vmem:[#allocation6 + $0xf8] sm:$0xf0]  ;;  %v2289_v55 = vld [vmem:[#allocation6 + $0xd4] sm:$0xf0]  ;;  %v2287_v36 = vld [vmem:[#allocation6 + $0xcc] sm:$0xf] }
  0x98   : > { %1277 = vmatpush.bf16.msra.mxu2 %v1927_v12  ;;  %v2323_v12 = vld [vmem:[#allocation6 + $0x1ec] sm:$0xf]  ;;  %v1999_v48 = vor.u32 %v2291_v26, %v1996_v27  ;;  %v2321_v35 = vld [vmem:[#allocation6 + $0x1d4] sm:$0xf0]  ;;  %v2108_v45 = vld [vmem:[#allocation6 + $0x1d8] sm:$0xf0] }
  0x99   : > { %1290 = vmatpush.bf16.msra.mxu3 %v2055_v31  ;;  %v1978_v31 = vld [vmem:[#allocation6 + $0xc8] sm:$0xf]  ;;  %v2127_v32 = vor.u32 %v2323_v12, %v2124_v30  ;;  %v2285_v49 = vld [vmem:[#allocation6 + $0xb4] sm:$0xf0]  ;;  %v2283_v53 = vld [vmem:[#allocation6 + $0xac] sm:$0xf] }
  0x9a   : > { %1252 = vmatpush.bf16.msra.mxu0 %v1907_v34  ;;  %v1979_v33 = vor.u32 %v2289_v55, %v1978_v31  ;;  %v2106_v34 = vld [vmem:[#allocation6 + $0x1c8] sm:$0xf]  ;;  %v1964_v50 = vld [vmem:[#allocation6 + $0xb8] sm:$0xf0]  ;;  %v2281_v62 = vld [vmem:[#allocation6 + $0x94] sm:$0xf0] }
  0x9b   : > { %1265 = vmatpush.bf16.msra.mxu1 %v2035_v42  ;;  %v2107_v41 = vor.u32 %v2321_v35, %v2106_v34  ;;  %v1980_v42 = vld [vmem:[#allocation6 + $0xd8] sm:$0xf0]  ;;  %v1962_v47 = vld [vmem:[#allocation6 + $0xa8] sm:$0xf]  ;;  %v1967_v61 = vor.u32 %v2283_v53, %v1964_v50  ;;  %v2279_v10 = vld [vmem:[#allocation6 + $0x8c] sm:$0xf] }
  0x9c   : > { %1278 = vmatpush.bf16.msra.mxu2 %v1911_v43  ;;  %v2319_v43 = vld [vmem:[#allocation6 + $0x1cc] sm:$0xf]  ;;  %v1983_v44 = vor.u32 %v2287_v36, %v1980_v42  ;;  %v2090_v51 = vld [vmem:[#allocation6 + $0x1a8] sm:$0xf]  ;;  %v1963_v54 = vor.u32 %v2285_v49, %v1962_v47  ;;  %v2092_v59 = vld [vmem:[#allocation6 + $0x1b8] sm:$0xf0] }
  0x9d   : > { %1291 = vmatpush.bf16.msra.mxu3 %v2039_v46  ;;  %v2111_v46 = vor.u32 %v2319_v43, %v2108_v45  ;;  %v1946_v60 = vld [vmem:[#allocation6 + $0x88] sm:$0xf]  ;;  %v2076_v2 = vld [vmem:[#allocation6 + $0x198] sm:$0xf0]  ;;  %v2277_v12 = vld [vmem:[#allocation6 + $0x74] sm:$0xf0] }
  0x9e   : > { %1253 = vmatpush.bf16.msra.mxu0 %v1891_v52  ;;  %v2317_v52 = vld [vmem:[#allocation6 + $0x1b4] sm:$0xf0]  ;;  %v2074_v0 = vld [vmem:[#allocation6 + $0x188] sm:$0xf]  ;;  %v1947_v16 = vor.u32 %v2281_v62, %v1946_v60  ;;  %v2307_v36 = vld [vmem:[#allocation6 + $0x16c] sm:$0xf] }
  0x9f   : > { %1266 = vmatpush.bf16.msra.mxu1 %v2019_v57  ;;  %v2091_v57 = vor.u32 %v2317_v52, %v2090_v51  ;;  %v1930_v27 = vld [vmem:[#allocation6 + $0x68] sm:$0xf]  ;;  %v2309_v55 = vld [vmem:[#allocation6 + $0x174] sm:$0xf0] }
  0xa0   : > { %1279 = vmatpush.bf16.msra.mxu2 %v1895_v58  ;;  %v2315_v58 = vld [vmem:[#allocation6 + $0x1ac] sm:$0xf]  ;;  %v1931_v31 = vor.u32 %v2277_v12, %v1930_v27 }
  0xa1   : > { %1292 = vmatpush.bf16.msra.mxu3 %v2023_v56  ;;  %v2095_v6 = vor.u32 %v2315_v58, %v2092_v59 }
  0xa2   : > { %1254 = vmatpush.bf16.msra.mxu0 %v1875_v1  ;;  %v2313_v1 = vld [vmem:[#allocation6 + $0x194] sm:$0xf0] }
  0xa3   : > { %1267 = vmatpush.bf16.msra.mxu1 %v2003_v13  ;;  %v1948_v13 = vld [vmem:[#allocation6 + $0x98] sm:$0xf0]  ;;  %v2075_v17 = vor.u32 %v2313_v1, %v2074_v0 }
  0xa4   : > { %1280 = vmatpush.bf16.msra.mxu2 %v1879_v14  ;;  %v2311_v14 = vld [vmem:[#allocation6 + $0x18c] sm:$0xf] }
  0xa5   : > { %1293 = vmatpush.bf16.msra.mxu3 %v2007_v8  ;;  %v1951_v8 = vor.u32 %v2279_v10, %v1948_v13  ;;  %v2079_v19 = vor.u32 %v2311_v14, %v2076_v2 }
  0xa6   : > { %1299 = vmatpush.bf16.msrb.mxu0 %v1995_v24 }
  0xa7   : > { %1312 = vmatpush.bf16.msrb.mxu1 %v2123_v25 }
  0xa8   : > { %1325 = vmatpush.bf16.msrb.mxu2 %v1999_v48  ;;  %v2058_v48 = vld [vmem:[#allocation6 + $0x168] sm:$0xf] }
  0xa9   : > { %1338 = vmatpush.bf16.msrb.mxu3 %v2127_v32  ;;  %v2275_v32 = vld [vmem:[#allocation6 + $0x6c] sm:$0xf]  ;;  %v2059_v34 = vor.u32 %v2309_v55, %v2058_v48 }
  0xaa   : > { %1300 = vmatpush.bf16.msrb.mxu0 %v1979_v33  ;;  %v1932_v33 = vld [vmem:[#allocation6 + $0x78] sm:$0xf0] }
  0xab   : > { %1313 = vmatpush.bf16.msrb.mxu1 %v2107_v41  ;;  %v1935_v35 = vor.u32 %v2275_v32, %v1932_v33  ;;  %v2060_v41 = vld [vmem:[#allocation6 + $0x178] sm:$0xf0] }
  0xac   : > { %1326 = vmatpush.bf16.msrb.mxu2 %v1983_v44  ;;  %v2063_v43 = vor.u32 %v2307_v36, %v2060_v41 }
  0xad   : > { %1339 = vmatpush.bf16.msrb.mxu3 %v2111_v46 }
  0xae   : > { %1301 = vmatpush.bf16.msrb.mxu0 %v1963_v54 }
  0xaf   : > { %1314 = vmatpush.bf16.msrb.mxu1 %v2091_v57 }
  0xb0   : > { %1327 = vmatpush.bf16.msrb.mxu2 %v1967_v61 }
  0xb1   : > { %1340 = vmatpush.bf16.msrb.mxu3 %v2095_v6 }
  0xb2   : > { %1302 = vmatpush.bf16.msrb.mxu0 %v1947_v16 }
  0xb3   : > { %1315 = vmatpush.bf16.msrb.mxu1 %v2075_v17 }
  0xb4   : > { %1328 = vmatpush.bf16.msrb.mxu2 %v1951_v8 }
  0xb5   : > { %1341 = vmatpush.bf16.msrb.mxu3 %v2079_v19 }
  0xb6   : > { %1303 = vmatpush.bf16.msrb.mxu0 %v1931_v31 }
  0xb7   : > { %1316 = vmatpush.bf16.msrb.mxu1 %v2059_v34 }
  0xb8   : > { %1329 = vmatpush.bf16.msrb.mxu2 %v1935_v35 }
  0xb9   : > { %1342 = vmatpush.bf16.msrb.mxu3 %v2063_v43 }
 0x101   : > { %v729_v56 = vpop.xlane.xlu0 %728 }
 0x102   : > { %v730_v5 = vmax.f32 %v729_v56, 1e-24 }
 0x104   : > { %2431 = vrsqrt.f32 %v730_v5  ;;  %vm737_vm8 = vweird.f32 %v730_v5 }
 0x10a   : > { %v2432_v20 = vpop.eup %2431 }
 0x10b   : > { %v732_v38 = vmul.f32 %v2432_v20, %v730_v5  ;;  %vm738_vm7 = vweird.f32 %v2432_v20 }
 0x10c   : > { %vm739_vm9 = vmor %vm737_vm8, %vm738_vm7 }
 0x10d   : > { %v733_v24 = vmul.f32 %v2432_v20, %v732_v38 }
 0x10f   : > { %v734_v25 = vmul.f32 0.5, %v733_v24 }
 0x111   : > { %v735_v26 = vsub.f32 1.5, %v734_v25 }
 0x113   : > { %v736_v30 = vmul.f32 %v2432_v20, %v735_v26 }
 0x115   : > { %v740_v42 = vsel %vm739_vm9, %v2432_v20, %v736_v30 }
 0x116   : > { %v742_v45 = vrot.slane %v740_v42, 1  ;;  %v743_v44 = vrot.slane %v740_v42, 2  ;;  %v744_v46 = vrot.slane %v740_v42, 3  ;;  %v745_v47 = vrot.slane %v740_v42, 4 }
 0x117   : > { %v746_v49 = vrot.slane %v740_v42, 5  ;;  %v747_v51 = vrot.slane %v740_v42, 6  ;;  %v748_v52 = vrot.slane %v740_v42, 7  ;;  %v757_v53 = vmul.f32 %v740_v42, %v2798_v63 }
 0x118   : > { %v759_v50 = vmul.f32 %v742_v45, %v2804_v9  ;;  %v761_v54 = vmul.f32 %v743_v44, %v2810_v18  ;;  %v763_v57 = vmul.f32 %v744_v46, %v2816_v22  ;;  %v765_v58 = vmul.f32 %v745_v47, %v2821_v39 }
 0x119   : > { %v767_v59 = vmul.f32 %v746_v49, %v2825_v28  ;;  %v769_v60 = vmul.f32 %v747_v51, %v2839_v37  ;;  %v771_v56 = vmul.f32 %v748_v52, %v2862_v3  ;;  %v773_v61 = vpack.c.bf16 %v757_v53, %v757_v53 }
 0x11a   : > { %v775_v62 = vpack.c.bf16 %v759_v50, %v759_v50  ;;  %v777_v0 = vpack.c.bf16 %v761_v54, %v761_v54  ;;  %v779_v1 = vpack.c.bf16 %v763_v57, %v763_v57  ;;  %v781_v63 = vpack.c.bf16 %v765_v58, %v765_v58  ;;  %v2303_v50 = vld [vmem:[#allocation6 + $0x14c] sm:$0xf]  ;;  %v2044_v54 = vld [vmem:[#allocation6 + $0x158] sm:$0xf0]  ;;  %v1898_v57 = vld [vmem:[#allocation6 + $0x28] sm:$0xf] }
 0x11b   : > { %v783_v5 = vpack.c.bf16 %v767_v59, %v767_v59  ;;  %v785_v6 = vpack.c.bf16 %v769_v60, %v769_v60  ;;  %v787_v9 = vpack.c.bf16 %v771_v56, %v771_v56  ;;  %v879_v14 = vunpack.c.l.b16 %v773_v61  ;;  %v2269_v61 = vld [vmem:[#allocation6 + $0x34] sm:$0xf0] }
 0x11c   : > { %v881_v10 = vunpack.c.l.b16 %v775_v62  ;;  %v883_v18 = vunpack.c.l.b16 %v777_v0  ;;  %v885_v13 = vunpack.c.l.b16 %v779_v1  ;;  %v887_v22 = vunpack.c.l.b16 %v781_v63  ;;  %v2026_v62 = vld [vmem:[#allocation6 + $0x128] sm:$0xf]  ;;  %v2301_v63 = vld [vmem:[#allocation6 + $0x134] sm:$0xf0] }
 0x11d   : > { %v889_v39 = vunpack.c.l.b16 %v783_v5  ;;  %v891_v2 = vunpack.c.l.b16 %v785_v6  ;;  %v893_v28 = vunpack.c.l.b16 %v787_v9  ;;  %v758_v3 = vmul.f32 %v740_v42, %v2801_v4  ;;  %v2273_v42 = vld [vmem:[#allocation6 + $0x54] sm:$0xf0]  ;;  %v2267_v5 = vld [vmem:[#allocation6 + $0x2c] sm:$0xf]  ;;  %v1900_v6 = vld [vmem:[#allocation6 + $0x38] sm:$0xf0] }
 0x11e   : > { %v895_v16 = vrot.slane %v881_v10, 7  ;;  %v897_v37 = vrot.slane %v883_v18, 6  ;;  %v899_v17 = vrot.slane %v885_v13, 5  ;;  %v901_v8 = vrot.slane %v887_v22, 4  ;;  %v2299_v22 = vld [vmem:[#allocation6 + $0x12c] sm:$0xf] }
 0x11f   : > { %v903_v19 = vrot.slane %v889_v39, 3  ;;  %v905_v20 = vrot.slane %v891_v2, 2  ;;  %v760_v38 = vmul.f32 %v742_v45, %v2807_v15  ;;  %v762_v25 = vmul.f32 %v743_v44, %v2813_v21 }
 0x120   : > { %v896_v24 = vsel %vm704_vm0, %v895_v16, %v879_v14  ;;  %v764_v26 = vmul.f32 %v744_v46, %v2819_v23  ;;  %v766_v27 = vmul.f32 %v745_v47, %v2823_v11  ;;  %v768_v48 = vmul.f32 %v746_v49, %v2827_v29  ;;  %v1914_v29 = vld [vmem:[#allocation6 + $0x48] sm:$0xf]  ;;  %v2305_v46 = vld [vmem:[#allocation6 + $0x154] sm:$0xf0]  ;;  %v2271_v47 = vld [vmem:[#allocation6 + $0x4c] sm:$0xf] }
 0x121   : > { %v898_v12 = vsel %vm706_vm1, %v897_v37, %v896_v24  ;;  %v770_v30 = vmul.f32 %v747_v51, %v2841_v40  ;;  %v772_v4 = vmul.f32 %v748_v52, %v2865_v7  ;;  %v774_v55 = vpack.c.bf16 %v758_v3, %v758_v3  ;;  %v2042_v40 = vld [vmem:[#allocation6 + $0x148] sm:$0xf]  ;;  %v1916_v49 = vld [vmem:[#allocation6 + $0x58] sm:$0xf0]  ;;  %v2297_v24 = vld [vmem:[#allocation6 + $0x114] sm:$0xf0] }
 0x122   : > { %v900_v31 = vsel %vm708_vm2, %v899_v17, %v898_v12  ;;  %v776_v15 = vpack.c.bf16 %v760_v38, %v760_v38  ;;  %v778_v32 = vpack.c.bf16 %v762_v25, %v762_v25  ;;  %v780_v21 = vpack.c.bf16 %v764_v26, %v764_v26  ;;  %v2028_v14 = vld [vmem:[#allocation6 + $0x138] sm:$0xf0]  ;;  %v1882_v37 = vld [vmem:[#allocation6 + $0x8] sm:$0xf]  ;;  %v2265_v17 = vld [vmem:[#allocation6 + $0x14] sm:$0xf0] }
 0x123   : > { %v902_v33 = vsel %vm710_vm3, %v901_v8, %v900_v31  ;;  %v782_v34 = vpack.c.bf16 %v766_v27, %v766_v27  ;;  %v784_v23 = vpack.c.bf16 %v768_v48, %v768_v48  ;;  %v907_v35 = vrot.slane %v893_v28, 1  ;;  %v2010_v38 = vld [vmem:[#allocation6 + $0x108] sm:$0xf]  ;;  %v2263_v48 = vld [vmem:[#allocation6 + $0xc] sm:$0xf] }
 0x124   : > { %v904_v11 = vsel %vm712_vm4, %v903_v19, %v902_v33  ;;  %v786_v36 = vpack.c.bf16 %v770_v30, %v770_v30  ;;  %v788_v41 = vpack.c.bf16 %v772_v4, %v772_v4  ;;  %v882_v43 = vunpack.c.l.b16 %v776_v15  ;;  %v1884_v30 = vld [vmem:[#allocation6 + $0x18] sm:$0xf0] }
 0x125   : > { %v906_v7 = vsel %vm714_vm5, %v905_v20, %v904_v11  ;;  %v884_v45 = vunpack.c.l.b16 %v778_v32  ;;  %v886_v44 = vunpack.c.l.b16 %v780_v21  ;;  %v880_v52 = vunpack.c.l.b16 %v774_v55  ;;  %v2295_v55 = vld [vmem:[#allocation6 + $0x10c] sm:$0xf]  ;;  %v2012_v15 = vld [vmem:[#allocation6 + $0x118] sm:$0xf0] }
 0x126   : > { %v908_v51 = vsel %vm716_vm6, %v907_v35, %v906_v7  ;;  %v888_v53 = vunpack.c.l.b16 %v782_v34  ;;  %v890_v59 = vunpack.c.l.b16 %v784_v23  ;;  %v909_v60 = vrot.slane %v882_v43, 7  ;;  %v853_v7 = vld [vmem:[%s2996_s2] sm:$0xf] }
 0x127   : > { %v923_v58 = vpack.c.b16 %v908_v51, %v908_v51  ;;  %v911_v56 = vrot.slane %v884_v45, 6  ;;  %v892_v0 = vunpack.c.l.b16 %v786_v36  ;;  %v894_v1 = vunpack.c.l.b16 %v788_v41 }
 0x128   : > { %v910_v9 = vsel %vm704_vm0, %v909_v60, %v880_v52  ;;  %v913_v10 = vrot.slane %v886_v44, 5  ;;  %v1915_v18 = vor.u32 %v2273_v42, %v1914_v29  ;;  %v2043_v13 = vor.u32 %v2305_v46, %v2042_v40 }
 0x129   : > { %1255 = vmatmul.bf16.vlgmr.msra.gmra.mxu0 %v923_v58  ;;  %1281 = vmatmul.bf16.vlgmr.msra.gmra.mxu2 %v923_v58  ;;  %v912_v39 = vsel %vm706_vm1, %v911_v56, %v910_v9  ;;  %v915_v2 = vrot.slane %v888_v53, 4  ;;  %v1919_v28 = vor.u32 %v2271_v47, %v1916_v49  ;;  %v2047_v16 = vor.u32 %v2303_v50, %v2044_v54 }
 0x12a   : > { %v914_v3 = vsel %vm708_vm2, %v913_v10, %v912_v39  ;;  %v917_v8 = vrot.slane %v890_v59, 3  ;;  %1304 = vmatpush.bf16.msrb.mxu0 %v1915_v18  ;;  %1317 = vmatpush.bf16.msrb.mxu1 %v2043_v13  ;;  %v1899_v19 = vor.u32 %v2269_v61, %v1898_v57  ;;  %v2027_v20 = vor.u32 %v2301_v63, %v2026_v62 }
 0x12b   : > { %v916_v25 = vsel %vm710_vm3, %v915_v2, %v914_v3  ;;  %v919_v26 = vrot.slane %v892_v0, 2  ;;  %1330 = vmatpush.bf16.msrb.mxu2 %v1919_v28  ;;  %1343 = vmatpush.bf16.msrb.mxu3 %v2047_v16  ;;  %v1903_v27 = vor.u32 %v2267_v5, %v1900_v6  ;;  %v2031_v12 = vor.u32 %v2299_v22, %v2028_v14 }
 0x12c   : > { %v918_v4 = vsel %vm712_vm4, %v917_v8, %v916_v25  ;;  %v921_v31 = vrot.slane %v894_v1, 1  ;;  %v1883_v21 = vor.u32 %v2265_v17, %v1882_v37  ;;  %v2011_v34 = vor.u32 %v2297_v24, %v2010_v38 }
 0x12d   : > { %v920_v32 = vsel %vm714_vm5, %v919_v26, %v918_v4  ;;  %v1887_v11 = vor.u32 %v2263_v48, %v1884_v30  ;;  %v2015_v35 = vor.u32 %v2295_v55, %v2012_v15  ;;  %v856_v45 = vperm.slane %v853_v7, 1 }
 0x12e   : > { %v922_v33 = vsel %vm716_vm6, %v921_v31, %v920_v32  ;;  %1305 = vmatpush.bf16.msrb.mxu0 %v1899_v19  ;;  %1318 = vmatpush.bf16.msrb.mxu1 %v2027_v20  ;;  %v855_v47 = vperm.slane %v853_v7, 0  ;;  %v857_v49 = vperm.slane %v853_v7, 2 }
 0x12f   : > { %v924_v23 = vpack.c.b16 %v922_v33, %v922_v33  ;;  %1331 = vmatpush.bf16.msrb.mxu2 %v1903_v27  ;;  %1344 = vmatpush.bf16.msrb.mxu3 %v2031_v12 }
 0x131   : > { %1268 = vmatmul.bf16.vlgmr.msra.gmra.mxu1 %v924_v23  ;;  %1294 = vmatmul.bf16.vlgmr.msra.gmra.mxu3 %v924_v23 }
 0x132   : > { %1306 = vmatpush.bf16.msrb.mxu0 %v1883_v21  ;;  %1319 = vmatpush.bf16.msrb.mxu1 %v2011_v34 }
 0x133   : > { %1332 = vmatpush.bf16.msrb.mxu2 %v1887_v11  ;;  %1345 = vmatpush.bf16.msrb.mxu3 %v2015_v35 }
 0x139   : > { %1307 = vmatmul.bf16.vlgmr.msrb.gmra.mxu0 %v923_v58  ;;  %1333 = vmatmul.bf16.vlgmr.msrb.gmra.mxu2 %v923_v58  ;;  %v858_v58 = vperm.slane %v853_v7, 3 }
 0x141   : > { %1320 = vmatmul.bf16.vlgmr.msrb.gmra.mxu1 %v924_v23  ;;  %1346 = vmatmul.bf16.vlgmr.msrb.gmra.mxu3 %v924_v23 }
 0x1a6   : > { %v1256_v36 = vpop.f32.mrf.mxu0 }
 0x1a7   : > { %v1257_v52 = vadd.f32 %v1256_v36, %v855_v47 }
 0x1ac   : > { %v1282_v41 = vpop.f32.mrf.mxu2 }
 0x1ad   : > { %v1283_v51 = vadd.f32 %v1282_v41, %v856_v45 }
 0x1ae   : > { %v1258_v29 = vpop.f32.mrf.mxu0  ;;  %v1269_v42 = vpop.f32.mrf.mxu1 }
 0x1af   : > { %v1270_v56 = vadd.f32 %v1269_v42, %v1257_v52 }
 0x1b1   : > { %v1351_v1 = vmul.f32 %v1270_v56, %v1270_v56 }
 0x1b4   : > { %v1284_v40 = vpop.f32.mrf.mxu2  ;;  %v1295_v43 = vpop.f32.mrf.mxu3 }
 0x1b5   : > { %v1296_v57 = vadd.f32 %v1295_v43, %v1283_v51 }
 0x1b6   : > { %v1308_v44 = vpop.f32.mrf.mxu0  ;;  %v1271_v46 = vpop.f32.mrf.mxu1 }
 0x1b7   : > { %v1309_v53 = vadd.f32 %v1308_v44, %v857_v49  ;;  %v1352_v62 = vmul.f32 %v1296_v57, %v1296_v57 }
 0x1b9   : > { %v1355_v9 = vadd.f32 %v1352_v62, %v1351_v1 }
 0x1bc   : > { %v1334_v50 = vpop.f32.mrf.mxu2  ;;  %v1297_v54 = vpop.f32.mrf.mxu3 }
 0x1bd   : > { %v1335_v0 = vadd.f32 %v1334_v50, %v858_v58 }
 0x1be   : > { %v1310_v59 = vpop.f32.mrf.mxu0  ;;  %v1321_v60 = vpop.f32.mrf.mxu1 }
 0x1bf   : > { %v1322_v61 = vadd.f32 %v1321_v60, %v1309_v53 }
 0x1c1   : > { %v1353_v63 = vmul.f32 %v1322_v61, %v1322_v61 }
 0x1c3   : > { %v1356_v22 = vadd.f32 %v1355_v9, %v1353_v63 }
 0x1c4   : > { %v1336_v5 = vpop.f32.mrf.mxu2  ;;  %v1347_v6 = vpop.f32.mrf.mxu3 }
 0x1c5   : > { %v1348_v10 = vadd.f32 %v1347_v6, %v1335_v0 }
 0x1c6   : > { %v1323_v18 = vpop.f32.mrf.mxu1 }
 0x1c7   : > { %v1354_v13 = vmul.f32 %v1348_v10, %v1348_v10 }
 0x1c9   : > { %v1357_v14 = vadd.f32 %v1356_v22, %v1354_v13 }
 0x1cb   : > { %1358 = vadd.xlane.f32.xlu0 %v1357_v14 }
 0x1cc   : > { %v1349_v39 = vpop.f32.mrf.mxu3 }
 0x23e   : > { %v1359_v2 = vpop.xlane.xlu0 %1358 }
 0x23f   : > { %v1360_v28 = vmax.f32 %v1359_v2, 1e-24 }
 0x241   : > { %2433 = vrsqrt.f32 %v1360_v28  ;;  %vm1367_vm11 = vweird.f32 %v1360_v28 }
 0x247   : > { %v2434_v16 = vpop.eup %2433 }
 0x248   : > { %v1362_v37 = vmul.f32 %v2434_v16, %v1360_v28  ;;  %vm1368_vm10 = vweird.f32 %v2434_v16 }
 0x249   : > { %vm1369_vm12 = vmor %vm1367_vm11, %vm1368_vm10 }
 0x24a   : > { %v1363_v17 = vmul.f32 %v2434_v16, %v1362_v37 }
 0x24c   : > { %v1364_v3 = vmul.f32 0.5, %v1363_v17 }
 0x24e   : > { %v1365_v8 = vsub.f32 1.5, %v1364_v3 }
 0x250   : > { %v1366_v19 = vmul.f32 %v2434_v16, %v1365_v8 }
 0x252   : > { %v1370_v20 = vsel %vm1369_vm12, %v2434_v16, %v1366_v19 }
 0x253   : > { %v1371_v38 = vmul.f32 %v1370_v20, %v1270_v56  ;;  %v1372_v24 = vmul.f32 %v1370_v20, %v1296_v57  ;;  %v1373_v25 = vmul.f32 %v1370_v20, %v1322_v61  ;;  %v1374_v26 = vmul.f32 %v1370_v20, %v1348_v10 }
 0x255   : > { %v1375_v27 = vpack.c.bf16 %v1372_v24, %v1371_v38  ;;  %v1376_v12 = vpack.c.bf16 %v1374_v26, %v1373_v25 }
 0x257   : > { %1377 = vst [vmem:[#allocation2] sm:$0xff] %v1375_v27 }
 0x258   : > { %1378 = vst [vmem:[#allocation2 + $0x8] sm:$0xff] %v1376_v12 }
 0x259 PF: > { %v2333_v48 = vld [vmem:[%s2762_s15 + $0x38] sm:$0xff]  ;;  %v2332_v55 = vld [vmem:[%s2762_s15 + $0x30] sm:$0xff]  ;;  %v2612_v21 = vmov 0   ;;  %v2331_v34 = vld [vmem:[%s2762_s15 + $0x28] sm:$0xff]  ;;  %v1708_v18 = vlaneseq  ;;  %s2256_s12 = sshll.u32 %s2669_s25, 7  ;;  %s2259_s10 = sshll.u32 %s2669_s25, 3 }
 0x25a   : > { %v2341_v30 = vld [vmem:[%s2762_s15 + $0x78] sm:$0xff]  ;;  %1651 = vmatpush.bf16.msra.mxu0 %v2333_v48  ;;  %v2340_v15 = vld [vmem:[%s2762_s15 + $0x70] sm:$0xff]  ;;  %2435 = vset.pattern.permute.xlu0 %v2612_v21  ;;  %v2339_v23 = vld [vmem:[%s2762_s15 + $0x68] sm:$0xff]  ;;  %v1711_v2 = vstv %s2256_s12  ;;  %s1756_s27 = scalar_lea.hbm %s3000_s6, %s2259_s10  ;;  %s1758_s11 = sshll.u32 %s2777_s29, 4  ;;  %s1759_s11 = int_to_ptr.vmem [resolvable:$true] %s1758_s11 }
 0x25b   : > { %v2349_v4 = vld [vmem:[%s2762_s15 + $0xb8] sm:$0xff]  ;;  %1664 = vmatpush.bf16.msra.mxu1 %v2341_v30  ;;  %v2348_v32 = vld [vmem:[%s2762_s15 + $0xb0] sm:$0xff]  ;;  %v2347_v11 = vld [vmem:[%s2762_s15 + $0xa8] sm:$0xff]  ;;  %v1709_v14 = vand.u32 127, %v1708_v18  ;;  %s1746_s25 = scalar_lea.sflag [#allocation5], %s2759_s21 }
 0x25c   : > { %v2357_v31 = vld [vmem:[%s2762_s15 + $0xf8] sm:$0xff]  ;;  %1677 = vmatpush.bf16.msra.mxu2 %v2349_v4  ;;  %v2356_v33 = vld [vmem:[%s2762_s15 + $0xf0] sm:$0xff]  ;;  %v2355_v35 = vld [vmem:[%s2762_s15 + $0xe8] sm:$0xff] }
 0x25d   : > { %1690 = vmatpush.bf16.msra.mxu3 %v2357_v31  ;;  %v2330_v36 = vld [vmem:[%s2762_s15 + $0x20] sm:$0xff]  ;;  %v1713_v40 = vld [vmem:[%s2999_s5] sm:$0xff]  ;;  %v2329_v7 = vld [vmem:[%s2762_s15 + $0x18] sm:$0xff]  ;;  %v1712_v17 = vadd.s32 %v1711_v2, %v1709_v14 }
 0x25e   : > { %1652 = vmatpush.bf16.msra.mxu0 %v2332_v55  ;;  %v2338_v41 = vld [vmem:[%s2762_s15 + $0x60] sm:$0xff]  ;;  %1715 = vperm.xlu0 %2435, %v1713_v40   ;;  %v2337_v43 = vld [vmem:[%s2762_s15 + $0x58] sm:$0xff]  ;;  %v2328_v46 = vld [vmem:[%s2762_s15 + $0x10] sm:$0xff] }
 0x25f   : > { %1665 = vmatpush.bf16.msra.mxu1 %v2340_v15  ;;  %v2346_v29 = vld [vmem:[%s2762_s15 + $0xa0] sm:$0xff]  ;;  %v2345_v45 = vld [vmem:[%s2762_s15 + $0x98] sm:$0xff]  ;;  %v2336_v47 = vld [vmem:[%s2762_s15 + $0x50] sm:$0xff] }
 0x260   : > { %1678 = vmatpush.bf16.msra.mxu2 %v2348_v32  ;;  %v2354_v42 = vld [vmem:[%s2762_s15 + $0xe0] sm:$0xff]  ;;  %v2353_v44 = vld [vmem:[%s2762_s15 + $0xd8] sm:$0xff]  ;;  %v2344_v49 = vld [vmem:[%s2762_s15 + $0x90] sm:$0xff] }
 0x261   : > { %1691 = vmatpush.bf16.msra.mxu3 %v2356_v33  ;;  %v2352_v51 = vld [vmem:[%s2762_s15 + $0xd0] sm:$0xff]  ;;  %v2327_v52 = vld [vmem:[%s2762_s15 + $0x8] sm:$0xff]  ;;  %v1380_v58 = vld [vmem:[#allocation2 + $0x8] sm:$0xff] }
 0x262   : > { %1653 = vmatpush.bf16.msra.mxu0 %v2331_v34  ;;  %v2335_v53 = vld [vmem:[%s2762_s15 + $0x48] sm:$0xff]  ;;  %v1379_v50 = vld [vmem:[#allocation2] sm:$0xff]  ;;  %v2326_v56 = vld [vmem:[%s2762_s15] sm:$0xff]  ;;  %v1449_v62 = vunpack.c.l.b16 %v1380_v58  ;;  %v1450_v0 = vunpack.c.h.b16 %v1380_v58 }
 0x263   : > { %1666 = vmatpush.bf16.msra.mxu1 %v2339_v23  ;;  %v2343_v54 = vld [vmem:[%s2762_s15 + $0x88] sm:$0xff]  ;;  %v1447_v59 = vunpack.c.l.b16 %v1379_v50  ;;  %v1448_v60 = vunpack.c.h.b16 %v1379_v50  ;;  %v2334_v61 = vld [vmem:[%s2762_s15 + $0x40] sm:$0xff]  ;;  %v2436_v20 = vld [vmem:[%s315_s26] ss:$0 sm:$0xff]  ;;  %s2549_s26 = scalar_lea.hbm %s3000_s6, 16 }
 0x264   : > { %1679 = vmatpush.bf16.msra.mxu2 %v2347_v11  ;;  %v2351_v57 = vld [vmem:[%s2762_s15 + $0xc8] sm:$0xff]  ;;  %v2342_v1 = vld [vmem:[%s2762_s15 + $0x80] sm:$0xff]  ;;  %v1453_v9 = vpack.c.b16 %v1449_v62, %v1449_v62  ;;  %v1454_v10 = vpack.c.b16 %v1450_v0, %v1450_v0 }
 0x265   : > { %1692 = vmatpush.bf16.msra.mxu3 %v2355_v35  ;;  %v2350_v63 = vld [vmem:[%s2762_s15 + $0xc0] sm:$0xff]  ;;  %v1451_v5 = vpack.c.b16 %v1447_v59, %v1447_v59  ;;  %v1452_v6 = vpack.c.b16 %v1448_v60, %v1448_v60  ;;  %s1760_s15 = sshll.u32 %s1756_s27, 4  ;;  %s1761_s15 = int_to_ptr.hbm [resolvable:$true] %s1760_s15 }
 0x266   : > { %1654 = vmatpush.bf16.msra.mxu0 %v2330_v36  ;;  %s2543_s14 = sshra.s32 %s1761_s15, 4  ;;  %s2544_s14 = int_to_ptr.hbm [resolvable:$true] %s2543_s14 }
 0x267   : > { %1667 = vmatpush.bf16.msra.mxu1 %v2338_v41  ;;  %s2545_s7 = scalar_lea.hbm %s2544_s14, 8  ;;  %p2550_p8 = scmp.lt.s32.totalorder %s2544_s14, %s3000_s6 }
 0x268   : > { %1680 = vmatpush.bf16.msra.mxu2 %v2346_v29  ;;  %p2546_p6 = scmp.ne.s32.totalorder %s2544_s14, %s2545_s7  ;;  %p2551_p5 = scmp.lt.s32.totalorder %s2549_s26, %s2545_s7 }
 0x269   : > { %1693 = vmatpush.bf16.msra.mxu3 %v2354_v42 }
 0x26a   : > { %1655 = vmatpush.bf16.msra.mxu0 %v2329_v7  ;;  %p2547_p1 = pnand %p2546_p6, %p2700_p11  ;;  %p2552_p9 = por %p2551_p5, %p2550_p8 }
 0x26b   : > { %1668 = vmatpush.bf16.msra.mxu1 %v2337_v43 }
 0x26c   : > { %1681 = vmatpush.bf16.msra.mxu2 %v2345_v45  ;;  %p2548_p3 = pneg %p2547_p1 }
 0x26d   : > { %1694 = vmatpush.bf16.msra.mxu3 %v2353_v44 }
 0x26e   : > { %1656 = vmatpush.bf16.msra.mxu0 %v2328_v46  ;;  %p2553_p10 = pnand %p2552_p9, %p2548_p3 }
 0x26f   : > { %1669 = vmatpush.bf16.msra.mxu1 %v2336_v47 }
 0x270   : > { %1682 = vmatpush.bf16.msra.mxu2 %v2344_v49 }
 0x271   : > { %1695 = vmatpush.bf16.msra.mxu3 %v2352_v51 }
 0x272   : > { %1657 = vmatpush.bf16.msra.mxu0 %v2327_v52 }
 0x273   : > { %1670 = vmatpush.bf16.msra.mxu1 %v2335_v53 }
 0x274   : > { %1683 = vmatpush.bf16.msra.mxu2 %v2343_v54 }
 0x275   : > { %1696 = vmatpush.bf16.msra.mxu3 %v2351_v57 }
 0x276   : > { %1658 = vmatpush.bf16.msra.mxu0 %v2326_v56 }
 0x277   : > { %1671 = vmatpush.bf16.msra.mxu1 %v2334_v61 }
 0x278   : > { %1684 = vmatpush.bf16.msra.mxu2 %v2342_v1 }
 0x279   : > { %1697 = vmatpush.bf16.msra.mxu3 %v2350_v63  ;;  %1659 = vmatmul.bf16.vlgmr.msra.gmra.mxu0 %v1451_v5 }
 0x27a   : > { %1672 = vmatmul.bf16.vlgmr.msra.gmra.mxu1 %v1452_v6 }
 0x27b   : > { %1685 = vmatmul.bf16.vlgmr.msra.gmra.mxu2 %v1453_v9 }
 0x27c   : > { %1698 = vmatmul.bf16.vlgmr.msra.gmra.mxu3 %v1454_v10 }
 0x2d0   : > { %v1716_v28 = vpop.permute.xlu0 %1715 }
 0x2d1   : > { %vm1717_vm13 = vcmp.eq.s32.totalorder %v1712_v17, %v1716_v28 }
 0x2f6   : > { %v1660_v13 = vpop.f32.mrf.mxu0 }
 0x2f7   : > { %v1673_v22 = vpop.f32.mrf.mxu1 }
 0x2f8   : > { %v1674_v39 = vadd.f32 %v1673_v22, %v1660_v13 }
 0x2fe   : > { %v1686_v16 = vpop.f32.mrf.mxu2  ;;  %v1662_v8 = vpop.f32.mrf.mxu0 }
 0x2ff   : > { %v1699_v37 = vpop.f32.mrf.mxu3  ;;  %v1687_v3 = vadd.f32 %v1686_v16, %v1674_v39  ;;  %v1675_v19 = vpop.f32.mrf.mxu1 }
 0x301   : > { %v1700_v38 = vadd.f32 %v1699_v37, %v1687_v3 }
 0x303   : > { %v1707_v24 = vmul.f32 %v2436_v20, %v1700_v38 }
 0x305   : > { %v1718_v25 = vsel %vm1717_vm13, %v1707_v24, 0.0 }
 0x306   : > { %v1688_v26 = vpop.f32.mrf.mxu2  ;;  %1719 = vadd.xlane.f32.xlu0 %v1718_v25 }
 0x307   : > { %v1701_v27 = vpop.f32.mrf.mxu3 }
 0x379   : > { %v1720_v12 = vpop.xlane.xlu0 %1719 }
 0x37a   : > { %v1721_v48 = vmul.f32 %v1720_v12, %v1720_v12  ;;  %v1736_v36 = vmul.f32 0.87758255, %v1720_v12  ;;  %v2257_v42 = vadd.f32 -0.23971277, %v1720_v12  ;;  %vm1739_vm0 = vcmp.gt.f32.partialorder %v1720_v12, -0.87758255 }
 0x37c   : > { %v1722_v30 = vsub.f32 1.0, %v1721_v48 }
 0x37e   : > { %v1723_v4 = vmax.f32 %v1722_v30, 0.0 }
 0x380   : > { %2437 = vrsqrt.f32 %v1723_v4  ;;  %vm1731_vm14 = vcmp.eq.f32.partialorder %v1723_v4, inf  ;;  %v1734_v23 = vand.u32 2147483648, %v1723_v4  ;;  %vm1733_vm15 = vcmp.eq.f32.partialorder %v1723_v4, 0.0 }
 0x386   : > { %v2438_v31 = vpop.eup %2437 }
 0x387   : > { %v1725_v55 = vmul.f32 %v2438_v31, %v1723_v4 }
 0x389   : > { %v1726_v15 = vmul.f32 %v2438_v31, %v1725_v55 }
 0x38b   : > { %v1727_v32 = vmul.f32 0.5, %v1726_v15 }
 0x38d   : > { %v1728_v33 = vsub.f32 1.5, %v1727_v32 }
 0x38f   : > { %v1729_v21 = vmul.f32 %v2438_v31, %v1728_v33 }
 0x391   : > { %v1730_v34 = vmul.f32 %v1729_v21, %v1723_v4 }
 0x393   : > { %v1732_v11 = vsel %vm1731_vm14, %v1723_v4, %v1730_v34 }
 0x394   : > { %v1735_v35 = vsel %vm1733_vm15, %v1734_v23, %v1732_v11 }
 0x395   : > { %v1737_v41 = vmul.f32 0.47942555, %v1735_v35 }
 0x397   : > { %v1738_v29 = vsub.f32 %v1736_v36, %v1737_v41 }
 0x399   : > { %v1741_v40 = vsel %vm1739_vm0, %v1738_v29, %v2257_v42 }
 0x39a   : > { %v1742_v7 = vsel %vm1717_vm13, %v1741_v40, %v1707_v24 }
 0x39b   : > { %v1743_v43 = vmul.f32 30.0, %v1742_v7 }
 0x39d   : > { %1744 = vst [vmem:[%s2777_s29] sm:$0xff] %v1743_v43 }
 0x39e   : > { %2556 = shalt.err (!%p2553_p10)
}
 0x39f   : > { %2368 = dma.vmem_to_hbm [thread:$0]  (%p2700_p11), %s1759_s11, 128, %s1761_s15, %s1746_s25  }
 0x3a0 PF: > { %s3018_s21 = sld [smem:[#allocation14_spill]]  ;;  %p3020_p0 = scmp.ge.s32.totalorder %s2603_s24, 2 }
 0x3a2   : > { %p2382_p2 = pnand %p3020_p0, %p2704_p12 }
 0x3a4   : > { %p2383_p7 = pneg %p2382_p2 }
 0x3a6   : > { %s1772_s18 = sand.u32 1, %s3018_s21  }
 0x3a7   : > { %s1773_s28 = scalar_lea.sflag [#allocation5], %s1772_s18 }
 0x3a8   : > { %2586 = dma.done.wait (%p2383_p7), %s1773_s28, 128  }
 0x3a9   : > { %2588 = vsyncadd (%p2383_p7), %s1773_s28, 4294967168  ;;  %s3021_s24 = sld [smem:[#allocation15_spill]]  ;;  %s3023_s21 = smov %s2595_s22 }
 0x3aa   : > { %s3022_s12 = sld [smem:[#allocation16_spill]]  ;;  %s3024_s22 = smov %s2599_s23 }
 0x3af   : > { %p18_p4 = scmp.ge.s32.totalorder %s3021_s24, 4  }
 0x3b0   : > { %s3025_s23 = smov %s3022_s12 }
 0x3b1   :  { %20 = sbr.rel (!%p18_p4) target bundleno = 7 (0x7), region = 103 }
 0x3b6   :  { %1779 = vsyncpa [#allocation4], 1 }
 0x3b7   :  { %1781 = vsyncpa [#allocation4 + $0x1], 1 }
 0x3b8   :  { %1782 = vsyncpa [#allocation7], 1 }
 0x3b9   :  { %1783 = vsyncpa [#allocation5], 1 }
 0x3ba   :  { %1785 = vsyncpa [#allocation5 + $0x1], 1 }

</bundles_post_ra>
